<compile_context>
chip_gen: v7x
topology: tpu7x:2x2x1
jax: 0.10.0
libtpu: 0.0.40
codegen_flags: <defaults>
</compile_context>

<pallas_src>
import functools

import jax
import jax.numpy as jnp
import numpy as np
from jax import lax
from jax.experimental import pallas as pl
from jax.experimental.pallas import tpu as pltpu

_MIB = 1024 * 1024


def _tpu_vmem_capacity_bytes():
    """Best-effort physical VMEM capacity query (None when unavailable)."""
    try:
        get_info = getattr(pltpu, "get_tpu_info", None)
        if get_info is None:
            return None
        return getattr(get_info(), "vmem_capacity_bytes", None)
    except Exception:
        return None


def _default_vmem_budget():
    cap = _tpu_vmem_capacity_bytes()
    if cap is None:
        # Safe everywhere: v5e/v6e have 128 MiB physical VMEM, v7x 64 MiB per core.
        return 48 * _MIB
    if cap >= 100 * _MIB:          # v5e / v6e: use most of the 128 MiB
        return 96 * _MIB
    return min(48 * _MIB, int(cap * 0.75))   # v7x-like: leave headroom in 64 MiB


def _tile_candidates(dim, prefs):
    cands = [t for t in prefs if t <= dim and dim % t == 0]
    if dim not in cands:
        cands.append(dim)          # full-dim block is always legal
    return cands


def _choose_tiles(M, N, K, itemsizes, budget, tm, tn, tk):
    """Pick (tm, tn, tk): prefer big tm (weight reuse) > tn (A reuse) > tk, under budget."""
    bytes_a, bytes_b, bytes_c, bytes_out = itemsizes
    tms = [tm] if tm is not None else _tile_candidates(M, (512, 256, 128, 64, 32, 16, 8))
    tns = [tn] if tn is not None else _tile_candidates(N, (512, 256, 128))
    # tk == K first: drops the k grid axis and the f32 accumulator round trip.
    tks = [tk] if tk is not None else ([K] + _tile_candidates(K, (2048, 1024, 512, 256, 128)))

    def footprint(m, n, k):
        # double-buffered A, B, c(in), out + f32 accumulator scratch
        return (2 * m * k * bytes_a + 2 * n * k * bytes_b
                + 2 * m * n * bytes_c + 2 * m * n * bytes_out + m * n * 4)

    usable = int(budget * 0.8)
    for m in tms:
        for n in tns:
            for k in tks:
                if footprint(m, n, k) <= usable:
                    return m, n, k
    m, n, k = tms[-1], tns[-1], tks[-1]
    if tm is None and tn is None and tk is None and footprint(m, n, k) > budget:
        raise ValueError(
            f"grouped_gemm: no tile configuration fits the VMEM budget ({budget} B) "
            f"for M={M}, N={N}, K={K}; pass tm/tn/tk explicitly.")
    return m, n, k


def _make_work_metadata(seg_indptr, weight_indices, num_groups, tm, max_work):
    """Per-work-tile metadata.  One work tile = one (m-tile, segment) overlap."""
    seg_indptr = seg_indptr.astype(jnp.int32)
    starts = seg_indptr[:num_groups]
    ends = seg_indptr[1:num_groups + 1]
    nonempty = ends > starts
    first_tile = jnp.where(nonempty, starts // tm, 0)
    last_tile = jnp.where(nonempty, (ends - 1) // tm, 0)
    tiles_per_group = jnp.where(nonempty, last_tile - first_tile + 1, 0).astype(jnp.int32)
    work_offsets = jnp.concatenate(
        [jnp.zeros((1,), jnp.int32), jnp.cumsum(tiles_per_group, dtype=jnp.int32)])
    num_work = work_offsets[num_groups]

    w = jnp.arange(max_work, dtype=jnp.int32)
    # Segment of work item w: g with work_offsets[g] <= w < work_offsets[g+1].
    g = jnp.sum((w[:, None] >= work_offsets[None, 1:]).astype(jnp.int32), axis=-1)
    g = jnp.minimum(g, num_groups - 1)
    t = first_tile[g] + (w - work_offsets[g])

    # At least one work item runs even if every segment is empty so the single visited
    # output block is rewritten with its original c values.
    num_eff = jnp.maximum(num_work, 1)
    valid = (w < num_eff).astype(jnp.int32)
    last = num_eff - 1
    # Padded work items duplicate the last valid one (same block indices); together with
    # the frozen-k index_maps they trigger no extra DMA and are skipped via pl.when.
    g = jnp.where(valid == 1, g, g[last])
    t = jnp.where(valid == 1, t, t[last])

    m_tile_ids = t.astype(jnp.int32)
    expert_ids = weight_indices.astype(jnp.int32)[g]
    work_start = starts[g]
    work_end = ends[g]

    prev_tile = jnp.concatenate([jnp.full((1,), -1, jnp.int32), m_tile_ids[:-1]])
    first_visit = m_tile_ids != prev_tile
    row0 = m_tile_ids * tm
    full_tile = jnp.logical_and(work_start <= row0, work_end >= row0 + tm)
    # store_mode: 0 = interior tile, unmasked lane-dense store;
    #             1 = boundary tile, first visit  -> base = original c;
    #             2 = boundary tile, later visit  -> base = resident out block.
    store_mode = jnp.where(full_tile, 0, jnp.where(first_visit, 1, 2)).astype(jnp.int32)

    # c is only read when store_mode == 1.  Forward-fill the c block id so work items
    # that do not read c keep the previous block index (-> no DMA for them).
    needs_c = jnp.logical_and(store_mode == 1, valid == 1)
    last_needed = lax.cummax(jnp.where(needs_c, w, -1), axis=0)
    c_block_ids = jnp.where(last_needed >= 0,
                            m_tile_ids[jnp.maximum(last_needed, 0)], 0).astype(jnp.int32)

    return (m_tile_ids, expert_ids, work_start, work_end, store_mode, valid, c_block_ids)


def _grouped_gemm_kernel(m_tile_ref, expert_ref, start_ref, end_ref, mode_ref,
                         valid_ref, c_blk_ref,
                         a_ref, b_ref, c_ref, out_ref, *acc_scratch,
                         tm, k_tiles, weights_kn, precision):
    del expert_ref, c_blk_ref            # consumed by the BlockSpec index_maps only
    acc_ref = acc_scratch[0] if acc_scratch else None
    w = pl.program_id(1)
    k = pl.program_id(2)

    def _store(acc_f32):
        acc = acc_f32.astype(out_ref.dtype)
        mode = mode_ref[w]

        # Interior tile: unmasked, lane-dense store.
        @pl.when(mode == 0)
        def _():
            out_ref[...] = acc

        # Segment-boundary tile: mask rows of this segment only.
        @pl.when(mode != 0)
        def _():
            rows = m_tile_ref[w] * tm + lax.broadcasted_iota(jnp.int32, (tm, 1), 0)
            mask = jnp.logical_and(rows >= start_ref[w], rows < end_ref[w])

            @pl.when(mode == 1)          # first visit of this row tile: base = original c
            def _():
                out_ref[...] = jnp.where(mask, acc, c_ref[...])

            @pl.when(mode == 2)          # later visit: base = still-resident out block
            def _():
                out_ref[...] = jnp.where(mask, acc, out_ref[...])

    @pl.when(valid_ref[w] == 1)
    def _():
        if weights_kn:                   # b tile (tk, tn): plain NN contraction
            dims = (((1,), (0,)), ((), ()))
        else:                            # b tile (tn, tk): contract K against K (NT)
            dims = (((1,), (1,)), ((), ()))
        prod = lax.dot_general(a_ref[...], b_ref[0], dimension_numbers=dims,
                               preferred_element_type=jnp.float32,
                               precision=precision)
        if k_tiles == 1:
            _store(prod)                 # no accumulator round trip at all
        else:
            @pl.when(k == 0)
            def _():
                acc_ref[...] = prod      # direct write: no zero-fill + read-modify-write

            @pl.when(k > 0)
            def _():
                acc_ref[...] += prod

            @pl.when(k == k_tiles - 1)
            def _():
                _store(acc_ref[...])


def grouped_gemm(a, b, c, batch_size, weight_column_major,
                 seg_indptr=None, weight_indices=None,
                 use_fp8_w8a8=False, scale_a=None, scale_b=None,
                 block_shape=None, *, tm=None, tn=None, tk=None,
                 precision=None, pretranspose_weights=False,
                 vmem_limit_bytes=None):
    assert weight_column_major is True
    # TODO(synk): fp8 w8a8 (use_fp8_w8a8 / scale_a / scale_b / block_shape) not implemented.
    assert not use_fp8_w8a8, "fp8 w8a8 path not implemented"
    assert scale_a is None and scale_b is None and block_shape is None
    assert seg_indptr is not None

    M, K = a.shape
    E, N, Kb = b.shape
    assert K == Kb and c.shape == (M, N)

    if batch_size == 0:
        return c

    if weight_indices is None:
        weight_indices = jnp.arange(batch_size, dtype=jnp.int32)

    budget = vmem_limit_bytes if vmem_limit_bytes is not None else _default_vmem_budget()
    itemsizes = (jnp.dtype(a.dtype).itemsize, jnp.dtype(b.dtype).itemsize,
                 jnp.dtype(c.dtype).itemsize, jnp.dtype(c.dtype).itemsize)
    tm_sel, tn_sel, tk_sel = _choose_tiles(M, N, K, itemsizes, budget, tm, tn, tk)

    # v7x-style chips (2 TensorCores, ~64 MiB VMEM/core): keep the megacore "parallel"
    # n axis at extent >= 2 so both cores get work.  No-op on v5e/v6e (single TC).
    cap = _tpu_vmem_capacity_bytes()
    if (tn is None and cap is not None and cap < 100 * _MIB
            and N // tn_sel == 1 and tn_sel % 256 == 0):
        tn_sel //= 2
    tm, tn, tk = tm_sel, tn_sel, tk_sel
    assert M % tm == 0 and N % tn == 0 and K % tk == 0

    num_m_tiles = M // tm
    n_tiles = N // tn
    k_tiles = K // tk
    max_work = num_m_tiles + batch_size   # static bound on (m-tile, segment) overlaps

    (m_tile_ids, expert_ids, work_start, work_end, store_mode, valid,
     c_block_ids) = _make_work_metadata(seg_indptr, weight_indices, batch_size,
                                        tm, max_work)

    if precision is None:
        # Common MoE path is bf16; for f32 inputs DEFAULT keeps a single MXU pass
        # (HIGHEST would be a 6x bf16 decomposition).  Pass lax.Precision.HIGHEST
        # explicitly if exact f32 accumulation of f32 inputs is required.
        precision = lax.Precision.DEFAULT

    if pretranspose_weights:
        # One-off relayout to [E, K, N]: the kernel then issues a plain NN matmul with
        # no chance of per-tile weight transposes (prefer storing weights this way).
        b = jnp.swapaxes(b, 1, 2)
        b_block = (1, tk, tn)
        b_index_map = lambda n, w, k, tiles, ex, s, e, md, vd, cb: (ex[w], k * vd[w], n)
    else:
        b_block = (1, tn, tk)
        b_index_map = lambda n, w, k, tiles, ex, s, e, md, vd, cb: (ex[w], n, k * vd[w])

    kernel = functools.partial(_grouped_gemm_kernel, tm=tm, k_tiles=k_tiles,
                               weights_kn=pretranspose_weights, precision=precision)
    scratch_shapes = [] if k_tiles == 1 else [pltpu.VMEM((tm, tn), jnp.float32)]

    num_scalar = 7
    grid_spec = pltpu.PrefetchScalarGridSpec(
        num_scalar_prefetch=num_scalar,
        grid=(n_tiles, max_work, k_tiles),
        in_specs=[
            # A: rows of the current segment tile only; k frozen (k * valid) for padded
            # work items so the padded tail never re-DMAs.
            pl.BlockSpec((tm, tk),
                         lambda n, w, k, tiles, ex, s, e, md, vd, cb: (tiles[w], k * vd[w])),
            # B: expert weights selected via the scalar-prefetched expert id; k frozen too.
            pl.BlockSpec(b_block, b_index_map),
            # Original c: only fetched when a boundary-first-visit tile will read it
            # (block id forward-filled otherwise -> no extra DMA).
            pl.BlockSpec((tm, tn),
                         lambda n, w, k, tiles, ex, s, e, md, vd, cb: (cb[w], n)),
        ],
        out_specs=pl.BlockSpec((tm, tn),
                               lambda n, w, k, tiles, ex, s, e, md, vd, cb: (tiles[w], n)),
        scratch_shapes=scratch_shapes,
    )

    return pl.pallas_call(
        kernel,
        out_shape=jax.ShapeDtypeStruct((M, N), c.dtype),
        grid_spec=grid_spec,
        # c aliases the output: never-visited row tiles keep their original HBM values
        # with no extra copy.  The alias index counts ALL flat call operands
        # (7 scalar-prefetch arrays, then a, b, c) -> c is operand num_scalar + 2.
        input_output_aliases={num_scalar + 2: 0},
        compiler_params=pltpu.CompilerParams(
            # Grid order (n outer, w, k inner) is load-bearing: a later segment sharing a
            # row tile reads the still-resident output block (store_mode 2).  Do NOT mark
            # the w axis parallel or reorder it inside n.
            dimension_semantics=("parallel", "arbitrary", "arbitrary"),
            vmem_limit_bytes=int(budget),
        ),
    )(m_tile_ids, expert_ids, work_start, work_end, store_mode, valid,
      c_block_ids, a, b, c)


class GroupedGemmRunner:
    """JAX/Pallas analogue of sglang's GroupedGemmRunner (triton path only)."""

    def __init__(self, device=None, use_flashinfer: bool = False):
        assert not use_flashinfer  # flashinfer path asserts False in the reference too
        self.device = device
        self.use_flashinfer = use_flashinfer

    def forward(self, a, b, c, batch_size, weight_column_major,
                seg_indptr=None, weight_indices=None,
                use_fp8_w8a8=False, scale_a=None, scale_b=None,
                block_shape=None, **kwargs):
        assert weight_column_major is True
        return grouped_gemm(a, b, c, batch_size, weight_column_major,
                            seg_indptr, weight_indices,
                            use_fp8_w8a8, scale_a, scale_b, block_shape, **kwargs)

    __call__ = forward


def _reference(a, b, c, batch_size, seg_indptr, weight_indices):
    out = np.array(c, dtype=np.float64).copy()
    a = np.array(a, dtype=np.float64)
    b = np.array(b, dtype=np.float64)
    for g in range(batch_size):
        s, e = int(seg_indptr[g]), int(seg_indptr[g + 1])
        if e > s:
            w = b[int(weight_indices[g])]
            out[s:e] = a[s:e] @ w.T
    return out


if __name__ == "__main__":
    key = jax.random.PRNGKey(0)
    k_a, k_b, k_c = jax.random.split(key, 3)

    M, K, N, E = 128, 256, 256, 4
    batch_size = E

    a = jax.random.normal(k_a, (M, K), dtype=jnp.float32)
    b = jax.random.normal(k_b, (E, N, K), dtype=jnp.float32) * 0.1
    # Non-zero c so "rows outside all segments keep their original values" is tested.
    c_np = np.array(jax.random.normal(k_c, (M, N), dtype=jnp.float32))
    a_np, b_np = np.array(a), np.array(b)

    runner = GroupedGemmRunner(device=None, use_flashinfer=False)

    # Case 1: unaligned boundaries, one empty expert, shared row tiles, partial tail
    # tile.  HIGHEST precision so a tight reference check validates the masking /
    # residency / c-gating / frozen-k logic exactly.
    seg_indptr = jnp.array([0, 40, 40, 90, 120], dtype=jnp.int32)
    weight_indices = jnp.array([2, 0, 3, 1], dtype=jnp.int32)
    ref1 = _reference(a_np, b_np, c_np, batch_size, np.array(seg_indptr),
                      np.array(weight_indices))
    out1 = runner(a, b, jnp.asarray(c_np), batch_size, weight_column_major=True,
                  seg_indptr=seg_indptr, weight_indices=weight_indices,
                  tm=32, tn=128, tk=128, precision=lax.Precision.HIGHEST)
    out1 = jax.block_until_ready(out1)
    np.testing.assert_allclose(np.array(out1, dtype=np.float64), ref1,
                               rtol=1e-4, atol=1e-4)

    # Case 2: tile-aligned segments, trailing empty expert, fully default config
    # (auto tiles, k axis dropped, DEFAULT precision -> looser tolerance).
    seg_indptr2 = jnp.array([0, 32, 64, 128, 128], dtype=jnp.int32)
    ref2 = _reference(a_np, b_np, c_np, batch_size, np.array(seg_indptr2),
                      np.arange(batch_size))
    out2 = runner(a, b, jnp.asarray(c_np), batch_size, weight_column_major=True,
                  seg_indptr=seg_indptr2, weight_indices=None)
    out2 = jax.block_until_ready(out2)
    np.testing.assert_allclose(np.array(out2, dtype=np.float64), ref2,
                               rtol=5e-2, atol=5e-2)

    # Case 3: row tiles 2-3 are never touched by any segment -> they must keep their
    # original c values via the output alias; also exercises the pre-transposed
    # [E, K, N] weight path.
    seg_indptr3 = jnp.array([0, 32, 32, 64, 64], dtype=jnp.int32)
    ref3 = _reference(a_np, b_np, c_np, batch_size, np.array(seg_indptr3),
                      np.arange(batch_size))
    out3 = runner(a, b, jnp.asarray(c_np), batch_size, weight_column_major=True,
                  seg_indptr=seg_indptr3, weight_indices=None,
                  tm=32, pretranspose_weights=True,
                  precision=lax.Precision.HIGHEST)
    out3 = jax.block_until_ready(out3)
    out3_np = np.array(out3, dtype=np.float64)
    np.testing.assert_allclose(out3_np[:64], ref3[:64], rtol=1e-4, atol=1e-4)
    np.testing.assert_array_equal(out3_np[64:], np.array(c_np[64:], dtype=np.float64))

    print("KERNEL_OK")
</pallas_src>

<mosaic_0001>
module attributes {stable_mosaic.version = 11 : i64} {
  func.func @_grouped_gemm_kernel(%arg0: i32, %arg1: i32, %arg2: i32, %arg3: memref<8xi32, #tpu.memory_space<smem>>, %arg4: memref<8xi32, #tpu.memory_space<smem>>, %arg5: memref<8xi32, #tpu.memory_space<smem>>, %arg6: memref<8xi32, #tpu.memory_space<smem>>, %arg7: memref<8xi32, #tpu.memory_space<smem>>, %arg8: memref<8xi32, #tpu.memory_space<smem>>, %arg9: memref<8xi32, #tpu.memory_space<smem>>, %arg10: memref<32x128xf32, #tpu.memory_space<vmem>>, %arg11: memref<1x128x128xf32, #tpu.memory_space<vmem>>, %arg12: memref<32x128xf32, #tpu.memory_space<vmem>>, %arg13: memref<32x128xf32, #tpu.memory_space<vmem>>, %arg14: memref<32x128xf32, #tpu.memory_space<vmem>>) attributes {dimension_semantics = [#tpu.dimension_semantics<parallel>, #tpu.dimension_semantics<arbitrary>, #tpu.dimension_semantics<arbitrary>], iteration_bounds = array<i64: 2, 8, 2>, scalar_prefetch = 7 : i64, scratch_operands = 1 : i64, tpu.core_type = #tpu.core_type<tc>, window_params = [{transform_indices = @transform_0, window_bounds = array<i64: 32, 128>}, {transform_indices = @transform_1, window_bounds = array<i64: 1, 128, 128>}, {transform_indices = @transform_2, window_bounds = array<i64: 32, 128>}, {transform_indices = @transform_3, window_bounds = array<i64: 32, 128>}]} {
    %0 = arith.index_cast %arg1 : i32 to index
    %1 = memref.load %arg8[%0] : memref<8xi32, #tpu.memory_space<smem>>
    %c1_i32 = arith.constant 1 : i32
    %2 = arith.cmpi eq, %1, %c1_i32 : i32
    %3 = arith.extui %2 : i1 to i32
    %c0_i32 = arith.constant 0 : i32
    %4 = arith.cmpi ne, %3, %c0_i32 : i32
    scf.if %4 {
      %c0 = arith.constant 0 : index
      %c0_0 = arith.constant 0 : index
      %5 = vector.load %arg10[%c0, %c0_0] : memref<32x128xf32, #tpu.memory_space<vmem>>, vector<32x128xf32>
      %c0_1 = arith.constant 0 : index
      %c0_2 = arith.constant 0 : index
      %c0_3 = arith.constant 0 : index
      %6 = vector.load %arg11[%c0_1, %c0_2, %c0_3] : memref<1x128x128xf32, #tpu.memory_space<vmem>>, vector<1x128x128xf32>
      %7 = vector.shape_cast %6 : vector<1x128x128xf32> to vector<128x128xf32>
      %cst = arith.constant dense<0.000000e+00> : vector<32x128xf32>
      %8 = tpu.matmul %5, %7, %cst {dimension_numbers = #tpu.dot_dimension_numbers<[1], [1], [0], [0], [0, 0, 1, 0], [], []>, precision = #tpu.contract_precision<fp32>} : vector<32x128xf32>, vector<128x128xf32>, vector<32x128xf32> -> vector<32x128xf32>
      %c0_i32_4 = arith.constant 0 : i32
      %9 = arith.cmpi eq, %arg2, %c0_i32_4 : i32
      %10 = arith.extui %9 : i1 to i32
      %c0_i32_5 = arith.constant 0 : i32
      %11 = arith.cmpi ne, %10, %c0_i32_5 : i32
      scf.if %11 {
        %c0_10 = arith.constant 0 : index
        %c0_11 = arith.constant 0 : index
        %18 = vector.load %arg14[%c0_10, %c0_11] : memref<32x128xf32, #tpu.memory_space<vmem>>, vector<32x128xf32>
        tpu.vector_store %arg14[%c0_10, %c0_11], %8 {strides = array<i32>} : memref<32x128xf32, #tpu.memory_space<vmem>>, vector<32x128xf32>,
      } else {
      }
      %c0_i32_6 = arith.constant 0 : i32
      %12 = arith.cmpi sgt, %arg2, %c0_i32_6 : i32
      %13 = arith.extui %12 : i1 to i32
      %c0_i32_7 = arith.constant 0 : i32
      %14 = arith.cmpi ne, %13, %c0_i32_7 : i32
      scf.if %14 {
        %c0_10 = arith.constant 0 : index
        %c0_11 = arith.constant 0 : index
        %18 = vector.load %arg14[%c0_10, %c0_11] : memref<32x128xf32, #tpu.memory_space<vmem>>, vector<32x128xf32>
        %19 = arith.addf %18, %8 : vector<32x128xf32>
        %c0_12 = arith.constant 0 : index
        %c0_13 = arith.constant 0 : index
        %20 = vector.load %arg14[%c0_12, %c0_13] : memref<32x128xf32, #tpu.memory_space<vmem>>, vector<32x128xf32>
        tpu.vector_store %arg14[%c0_12, %c0_13], %19 {strides = array<i32>} : memref<32x128xf32, #tpu.memory_space<vmem>>, vector<32x128xf32>,
      } else {
      }
      %c1_i32_8 = arith.constant 1 : i32
      %15 = arith.cmpi eq, %arg2, %c1_i32_8 : i32
      %16 = arith.extui %15 : i1 to i32
      %c0_i32_9 = arith.constant 0 : i32
      %17 = arith.cmpi ne, %16, %c0_i32_9 : i32
      scf.if %17 {
        %c0_10 = arith.constant 0 : index
        %c0_11 = arith.constant 0 : index
        %18 = vector.load %arg14[%c0_10, %c0_11] : memref<32x128xf32, #tpu.memory_space<vmem>>, vector<32x128xf32>
        %19 = arith.index_cast %arg1 : i32 to index
        %20 = memref.load %arg7[%19] : memref<8xi32, #tpu.memory_space<smem>>
        %c0_i32_12 = arith.constant 0 : i32
        %21 = arith.cmpi eq, %20, %c0_i32_12 : i32
        %22 = arith.extui %21 : i1 to i32
        %c0_i32_13 = arith.constant 0 : i32
        %23 = arith.cmpi ne, %22, %c0_i32_13 : i32
        scf.if %23 {
          %c0_16 = arith.constant 0 : index
          %c0_17 = arith.constant 0 : index
          %27 = vector.load %arg13[%c0_16, %c0_17] : memref<32x128xf32, #tpu.memory_space<vmem>>, vector<32x128xf32>
          tpu.vector_store %arg13[%c0_16, %c0_17], %18 {strides = array<i32>} : memref<32x128xf32, #tpu.memory_space<vmem>>, vector<32x128xf32>,
        } else {
        }
        %c0_i32_14 = arith.constant 0 : i32
        %24 = arith.cmpi ne, %20, %c0_i32_14 : i32
        %25 = arith.extui %24 : i1 to i32
        %c0_i32_15 = arith.constant 0 : i32
        %26 = arith.cmpi ne, %25, %c0_i32_15 : i32
        scf.if %26 {
          %27 = arith.index_cast %arg1 : i32 to index
          %28 = memref.load %arg3[%27] : memref<8xi32, #tpu.memory_space<smem>>
          %c32_i32 = arith.constant 32 : i32
          %29 = arith.muli %28, %c32_i32 : i32
          %30 = tpu.iota {dimensions = array<i32: 0>} : vector<32x1xi32>
          %31 = vector.broadcast %29 : i32 to vector<32x1xi32>
          %32 = arith.addi %31, %30 : vector<32x1xi32>
          %33 = arith.index_cast %arg1 : i32 to index
          %34 = memref.load %arg5[%33] : memref<8xi32, #tpu.memory_space<smem>>
          %35 = vector.broadcast %34 : i32 to vector<32x1xi32>
          %36 = arith.cmpi sge, %32, %35 : vector<32x1xi32>
          %37 = arith.index_cast %arg1 : i32 to index
          %38 = memref.load %arg6[%37] : memref<8xi32, #tpu.memory_space<smem>>
          %39 = vector.broadcast %38 : i32 to vector<32x1xi32>
          %40 = arith.cmpi slt, %32, %39 : vector<32x1xi32>
          %41 = arith.andi %36, %40 : vector<32x1xi1>
          %c1_i32_16 = arith.constant 1 : i32
          %42 = arith.cmpi eq, %20, %c1_i32_16 : i32
          %43 = arith.extui %42 : i1 to i32
          %c0_i32_17 = arith.constant 0 : i32
          %44 = arith.cmpi ne, %43, %c0_i32_17 : i32
          scf.if %44 {
            %c0_19 = arith.constant 0 : index
            %c0_20 = arith.constant 0 : index
            %48 = vector.load %arg12[%c0_19, %c0_20] : memref<32x128xf32, #tpu.memory_space<vmem>>, vector<32x128xf32>
            %49 = vector.shape_cast %41 : vector<32x1xi1> to vector<32x1xi1>
            %50 = vector.broadcast %49 : vector<32x1xi1> to vector<32x128xi1>
            %51 = arith.select %50, %18, %48 : vector<32x128xi1>, vector<32x128xf32>
            %c0_21 = arith.constant 0 : index
            %c0_22 = arith.constant 0 : index
            %52 = vector.load %arg13[%c0_21, %c0_22] : memref<32x128xf32, #tpu.memory_space<vmem>>, vector<32x128xf32>
            tpu.vector_store %arg13[%c0_21, %c0_22], %51 {strides = array<i32>} : memref<32x128xf32, #tpu.memory_space<vmem>>, vector<32x128xf32>,
          } else {
          }
          %c2_i32 = arith.constant 2 : i32
          %45 = arith.cmpi eq, %20, %c2_i32 : i32
          %46 = arith.extui %45 : i1 to i32
          %c0_i32_18 = arith.constant 0 : i32
          %47 = arith.cmpi ne, %46, %c0_i32_18 : i32
          scf.if %47 {
            %c0_19 = arith.constant 0 : index
            %c0_20 = arith.constant 0 : index
            %48 = vector.load %arg13[%c0_19, %c0_20] : memref<32x128xf32, #tpu.memory_space<vmem>>, vector<32x128xf32>
            %49 = vector.shape_cast %41 : vector<32x1xi1> to vector<32x1xi1>
            %50 = vector.broadcast %49 : vector<32x1xi1> to vector<32x128xi1>
            %51 = arith.select %50, %18, %48 : vector<32x128xi1>, vector<32x128xf32>
            %c0_21 = arith.constant 0 : index
            %c0_22 = arith.constant 0 : index
            %52 = vector.load %arg13[%c0_21, %c0_22] : memref<32x128xf32, #tpu.memory_space<vmem>>, vector<32x128xf32>
            tpu.vector_store %arg13[%c0_21, %c0_22], %51 {strides = array<i32>} : memref<32x128xf32, #tpu.memory_space<vmem>>, vector<32x128xf32>,
          } else {
          }
        } else {
        }
      } else {
      }
    } else {
    }
    return
  }
  func.func @transform_0(%arg0: i32, %arg1: i32, %arg2: i32, %arg3: memref<8xi32, #tpu.memory_space<smem>>, %arg4: memref<8xi32, #tpu.memory_space<smem>>, %arg5: memref<8xi32, #tpu.memory_space<smem>>, %arg6: memref<8xi32, #tpu.memory_space<smem>>, %arg7: memref<8xi32, #tpu.memory_space<smem>>, %arg8: memref<8xi32, #tpu.memory_space<smem>>, %arg9: memref<8xi32, #tpu.memory_space<smem>>) -> (i32, i32) {
    %0 = arith.index_cast %arg1 : i32 to index
    %1 = memref.load %arg3[%0] : memref<8xi32, #tpu.memory_space<smem>>
    %2 = arith.index_cast %arg1 : i32 to index
    %3 = memref.load %arg8[%2] : memref<8xi32, #tpu.memory_space<smem>>
    %4 = arith.muli %arg2, %3 : i32
    %c0_i32 = arith.constant 0 : i32
    return %1, %4 : i32, i32
  }
  func.func @transform_1(%arg0: i32, %arg1: i32, %arg2: i32, %arg3: memref<8xi32, #tpu.memory_space<smem>>, %arg4: memref<8xi32, #tpu.memory_space<smem>>, %arg5: memref<8xi32, #tpu.memory_space<smem>>, %arg6: memref<8xi32, #tpu.memory_space<smem>>, %arg7: memref<8xi32, #tpu.memory_space<smem>>, %arg8: memref<8xi32, #tpu.memory_space<smem>>, %arg9: memref<8xi32, #tpu.memory_space<smem>>) -> (i32, i32, i32) {
    %0 = arith.index_cast %arg1 : i32 to index
    %1 = memref.load %arg4[%0] : memref<8xi32, #tpu.memory_space<smem>>
    %2 = arith.index_cast %arg1 : i32 to index
    %3 = memref.load %arg8[%2] : memref<8xi32, #tpu.memory_space<smem>>
    %4 = arith.muli %arg2, %3 : i32
    %c0_i32 = arith.constant 0 : i32
    return %1, %arg0, %4 : i32, i32, i32
  }
  func.func @transform_2(%arg0: i32, %arg1: i32, %arg2: i32, %arg3: memref<8xi32, #tpu.memory_space<smem>>, %arg4: memref<8xi32, #tpu.memory_space<smem>>, %arg5: memref<8xi32, #tpu.memory_space<smem>>, %arg6: memref<8xi32, #tpu.memory_space<smem>>, %arg7: memref<8xi32, #tpu.memory_space<smem>>, %arg8: memref<8xi32, #tpu.memory_space<smem>>, %arg9: memref<8xi32, #tpu.memory_space<smem>>) -> (i32, i32) {
    %0 = arith.index_cast %arg1 : i32 to index
    %1 = memref.load %arg9[%0] : memref<8xi32, #tpu.memory_space<smem>>
    %c0_i32 = arith.constant 0 : i32
    return %1, %arg0 : i32, i32
  }
  func.func @transform_3(%arg0: i32, %arg1: i32, %arg2: i32, %arg3: memref<8xi32, #tpu.memory_space<smem>>, %arg4: memref<8xi32, #tpu.memory_space<smem>>, %arg5: memref<8xi32, #tpu.memory_space<smem>>, %arg6: memref<8xi32, #tpu.memory_space<smem>>, %arg7: memref<8xi32, #tpu.memory_space<smem>>, %arg8: memref<8xi32, #tpu.memory_space<smem>>, %arg9: memref<8xi32, #tpu.memory_space<smem>>) -> (i32, i32) {
    %0 = arith.index_cast %arg1 : i32 to index
    %1 = memref.load %arg3[%0] : memref<8xi32, #tpu.memory_space<smem>>
    %c0_i32 = arith.constant 0 : i32
    return %1, %arg0 : i32, i32
  }
}

</mosaic_0001>

<bundles_post_ra>
// kernel: tpu_custom_call.1
= control target key start
LH: loop header
LB: loop body
LE: loop exit
PB: predicated region body
PF: predicated region fallthrough
CT: control target
= control target key end

     0   :  { %s3447_s0 = inlined_call_operand.vmem [shape: s32[8], index: 0, kind: input, shape index: {}]   ;;  %s3448_s7 = inlined_call_operand.vmem [shape: f32[128,256], index: 7, kind: input, shape index: {}]   ;;  %s3449_s8 = inlined_call_operand.hbm [shape: f32[4,256,256], index: 8, kind: input, shape index: {}]   ;;  %s3450_s9 = inlined_call_operand.hbm [shape: f32[128,256], index: 9, kind: input, shape index: {}, may-alias: {9,10}]   ;;  %s3451_s10 = inlined_call_operand.hbm [shape: f32[128,256], index: 10, kind: output, shape index: {}, may-alias: {9,10}]   ;;  %s3452_s1 = inlined_call_operand.vmem [shape: s32[8], index: 1, kind: input, shape index: {}]   ;;  %s3453_s2 = inlined_call_operand.vmem [shape: s32[8], index: 2, kind: input, shape index: {}]   ;;  %s3454_s3 = inlined_call_operand.vmem [shape: s32[8], index: 3, kind: input, shape index: {}]   ;;  %s3455_s4 = inlined_call_operand.vmem [shape: s32[8], index: 4, kind: input, shape index: {}]   ;;  %s3456_s5 = inlined_call_operand.vmem [shape: s32[8], index: 5, kind: input, shape index: {}]   ;;  %s3457_s6 = inlined_call_operand.vmem [shape: s32[8], index: 6, kind: input, shape index: {}]  }
   0x1   :  { %3486 = sst [smem:[#allocation49_spill]] %s3448_s7  ;;  %s15_s15 = sshll.u32 %s3447_s0, 4  ;;  %s16_s15 = int_to_ptr.vmem [resolvable:$true] %s15_s15 }
   0x2   :  { %3487 = sst [smem:[#allocation50_spill]] %s3449_s8  ;;  %s19_s18 = sshll.u32 %s3452_s1, 4  ;;  %s20_s18 = int_to_ptr.vmem [resolvable:$true] %s19_s18 }
   0x3   :  { %3488 = sst [smem:[#allocation51_spill]] %s3450_s9  ;;  %s2256_s19 = scalar_lea.vmem %s16_s15, 16 }
   0x4   :  { %3489 = sst [smem:[#allocation52_spill]] %s3451_s10  ;;  %p2257_p0 = scmp.ne.s32.totalorder %s16_s15, %s2256_s19 }
   0x5   :  { %p2261_p1 = scmp.lt.s32.totalorder %s16_s15, %s16_s15  ;;  %p2262_p2 = scmp.lt.s32.totalorder %s2256_s19, %s2256_s19 }
   0x7   :  { %p2263_p3 = por %p2262_p2, %p2261_p1 }
   0x9   :  { %p2264_p4 = pnand %p2263_p3, %p2257_p0 }
   0xb   :  { %2267 = shalt.err (!%p2264_p4)  }
   0xc   :  { %s2582_s20 = smov [#allocation4]   ;;  %s2268_s21 = scalar_lea.vmem %s20_s18, 16 }
   0xd   :  { %18 = dma.vmem_to_smem %s16_s15, 16, %s2582_s20, [#allocation3] }
   0xe   :  { %p2269_p5 = scmp.ne.s32.totalorder %s20_s18, %s2268_s21  ;;  %p2273_p6 = scmp.lt.s32.totalorder %s20_s18, %s20_s18 }
   0xf   :  { %p2274_p7 = scmp.lt.s32.totalorder %s2268_s21, %s2268_s21 }
  0x11   :  { %p2275_p8 = por %p2274_p7, %p2273_p6 }
  0x13   :  { %p2276_p9 = pnand %p2275_p8, %p2269_p5 }
  0x15   :  { %2279 = shalt.err (!%p2276_p9)  }
  0x16   :  { %s2583_s0 = smov [#allocation5]   ;;  %s23_s23 = sshll.u32 %s3453_s2, 4  ;;  %s24_s23 = int_to_ptr.vmem [resolvable:$true] %s23_s23 }
  0x17   :  { %22 = dma.vmem_to_smem %s20_s18, 16, %s2583_s0, [#allocation3] }
  0x18   :  { %s27_s26 = sshll.u32 %s3454_s3, 4  ;;  %s2280_s27 = scalar_lea.vmem %s24_s23, 16  ;;  %s28_s26 = int_to_ptr.vmem [resolvable:$true] %s27_s26 }
  0x19   :  { %p2281_p10 = scmp.ne.s32.totalorder %s24_s23, %s2280_s27  ;;  %p2285_p11 = scmp.lt.s32.totalorder %s24_s23, %s24_s23 }
  0x1a   :  { %p2286_p12 = scmp.lt.s32.totalorder %s2280_s27, %s2280_s27 }
  0x1c   :  { %p2287_p13 = por %p2286_p12, %p2285_p11 }
  0x1e   :  { %p2288_p0 = pnand %p2287_p13, %p2281_p10 }
  0x20   :  { %2291 = shalt.err (!%p2288_p0)  }
  0x21   :  { %s2584_s28 = smov [#allocation6]   ;;  %s2292_s29 = scalar_lea.vmem %s28_s26, 16 }
  0x22   :  { %26 = dma.vmem_to_smem %s24_s23, 16, %s2584_s28, [#allocation3] }
  0x23   :  { %p2293_p1 = scmp.ne.s32.totalorder %s28_s26, %s2292_s29  ;;  %p2297_p2 = scmp.lt.s32.totalorder %s28_s26, %s28_s26 }
  0x24   :  { %p2298_p3 = scmp.lt.s32.totalorder %s2292_s29, %s2292_s29 }
  0x26   :  { %p2299_p4 = por %p2298_p3, %p2297_p2 }
  0x28   :  { %p2300_p5 = pnand %p2299_p4, %p2293_p1 }
  0x2a   :  { %2303 = shalt.err (!%p2300_p5)  }
  0x2b   :  { %s2585_s2 = smov [#allocation7]   ;;  %s31_s11 = sshll.u32 %s3455_s4, 4  ;;  %s32_s11 = int_to_ptr.vmem [resolvable:$true] %s31_s11 }
  0x2c   :  { %30 = dma.vmem_to_smem %s28_s26, 16, %s2585_s2, [#allocation3] }
  0x2d   :  { %s35_s14 = sshll.u32 %s3456_s5, 4  ;;  %s2304_s15 = scalar_lea.vmem %s32_s11, 16  ;;  %s36_s14 = int_to_ptr.vmem [resolvable:$true] %s35_s14 }
  0x2e   :  { %p2305_p6 = scmp.ne.s32.totalorder %s32_s11, %s2304_s15  ;;  %p2309_p7 = scmp.lt.s32.totalorder %s32_s11, %s32_s11 }
  0x2f   :  { %p2310_p8 = scmp.lt.s32.totalorder %s2304_s15, %s2304_s15 }
  0x31   :  { %p2311_p9 = por %p2310_p8, %p2309_p7 }
  0x33   :  { %p2312_p10 = pnand %p2311_p9, %p2305_p6 }
  0x35   :  { %2315 = shalt.err (!%p2312_p10)  }
  0x36   :  { %s2586_s16 = smov [#allocation8]   ;;  %s2316_s17 = scalar_lea.vmem %s36_s14, 16 }
  0x37   :  { %34 = dma.vmem_to_smem %s32_s11, 16, %s2586_s16, [#allocation3] }
  0x38   :  { %p2317_p11 = scmp.ne.s32.totalorder %s36_s14, %s2316_s17  ;;  %p2321_p12 = scmp.lt.s32.totalorder %s36_s14, %s36_s14 }
  0x39   :  { %p2322_p13 = scmp.lt.s32.totalorder %s2316_s17, %s2316_s17 }
  0x3b   :  { %p2323_p0 = por %p2322_p13, %p2321_p12 }
  0x3d   :  { %p2324_p1 = pnand %p2323_p0, %p2317_p11 }
  0x3f   :  { %2327 = shalt.err (!%p2324_p1)  }
  0x40   :  { %s2587_s4 = smov [#allocation9]   ;;  %s39_s19 = sshll.u32 %s3457_s6, 4  ;;  %s40_s19 = int_to_ptr.vmem [resolvable:$true] %s39_s19 }
  0x41   :  { %38 = dma.vmem_to_smem %s36_s14, 16, %s2587_s4, [#allocation3] }
  0x42   :  { %s2328_s20 = scalar_lea.vmem %s40_s19, 16  ;;  %p2333_p3 = scmp.lt.s32.totalorder %s40_s19, %s40_s19 }
  0x43   :  { %p2329_p2 = scmp.ne.s32.totalorder %s40_s19, %s2328_s20  ;;  %p2334_p4 = scmp.lt.s32.totalorder %s2328_s20, %s2328_s20 }
  0x45   :  { %p2335_p5 = por %p2334_p4, %p2333_p3 }
  0x47   :  { %p2336_p6 = pnand %p2335_p5, %p2329_p2 }
  0x49   :  { %2339 = shalt.err (!%p2336_p6)  }
  0x4a   :  { %s2588_s21 = smov [#allocation10]  }
  0x4b   :  { %42 = dma.vmem_to_smem %s40_s19, 16, %s2588_s21, [#allocation3] }
  0x4c   :  { %2496 = dma.done.wait [#allocation3], 112 }
  0x4d   :  { %2497 = vsyncadd [#allocation3], 4294967184 }
  0x4e   :  { %44 = sfence }
  0x4f   :  { %45 = vsyncpa [#allocation13], 0 }
  0x50   :  { %47 = vsyncpa [#allocation13 + $0x1], 0 }
  0x51   :  { %48 = vsyncpa [#allocation16], 0 }
  0x52   :  { %50 = vsyncpa [#allocation16 + $0x1], 0 }
  0x53   :  { %51 = vsyncpa [#allocation14], 0 }
  0x54   :  { %53 = vsyncpa [#allocation14 + $0x1], 0  ;;  %s2674_s6 = smov 0   ;;  %s2676_s0 = smov 0  }
  0x55   :  { %s2678_s1 = smov 0   ;;  %s2680_s22 = smov 0  }
  0x56   :  { %s2682_s23 = smov 0   ;;  %s2684_s24 = smov 0  }
  0x57   :  { %s2686_s25 = smov 0   ;;  %s2688_s26 = smov 0  }
  0x58   :  { %s2690_s27 = smov 0   ;;  %s2692_s28 = smov 0  }
  0x59   :  { %s2694_s29 = smov 0   ;;  %s2696_s2 = smov 0  }
  0x5a   :  { %s2698_s3 = smov 0   ;;  %s2700_s30 = smov 0  }
  0x5b   :  { %s2702_s11 = smov 0   ;;  %s2704_s12 = smov 0  }
  0x5c   :  { %s2706_s13 = smov 0   ;;  %s2708_s14 = smov 0  }
  0x5d LB: > { %3490 = sst [smem:[#allocation26_spill]] %s2512_s6  ;;  %s71_s16 = sadd.s32 1, %s2568_s11  ;;  %s2580_s14 = sphi %s2708_s14, %s59_s14   ;;  %s2576_s13 = sphi %s2706_s13, %s3573_s13   ;;  %s2572_s12 = sphi %s2704_s12, %s3582_s12   ;;  %s2568_s11 = sphi %s2702_s11, %s3581_s11   ;;  %s2564_s30 = sphi %s2700_s30, %s3570_s30   ;;  %s2560_s3 = sphi %s2698_s3, %s3580_s3   ;;  %s2556_s2 = sphi %s2696_s2, %s3579_s2   ;;  %s2552_s29 = sphi %s2694_s29, %s3569_s29   ;;  %s2548_s28 = sphi %s2692_s28, %s3578_s28   ;;  %s2544_s27 = sphi %s2690_s27, %s3567_s27   ;;  %s2540_s26 = sphi %s2688_s26, %s3577_s26   ;;  %s2536_s25 = sphi %s2686_s25, %s3576_s25   ;;  %s2532_s24 = sphi %s2684_s24, %s3575_s24   ;;  %s2528_s23 = sphi %s2682_s23, %s3574_s23   ;;  %s2524_s22 = sphi %s2680_s22, %s3564_s22   ;;  %s2520_s1 = sphi %s2678_s1, %s3563_s1   ;;  %s2516_s0 = sphi %s2676_s0, %s3562_s0   ;;  %s2512_s6 = sphi %s2674_s6, %s3561_s6  }
  0x5e   : > { %3491 = sst [smem:[#allocation27_spill]] %s2516_s0  ;;  %s74_s17 = sadd.s32 1, %s2572_s12 }
  0x5f   : > { %3492 = sst [smem:[#allocation28_spill]] %s2520_s1  ;;  %p72_p7 = scmp.ge.s32.totalorder %s71_s16, 2 }
  0x60   : > { %3493 = sst [smem:[#allocation29_spill]] %s2528_s23  ;;  %s78_s4 = sadd.s32 1, %s2576_s13 }
  0x61   : > { %3494 = sst [smem:[#allocation30_spill]] %s2544_s27  ;;  %s3584_s16 = smov (%p72_p7, %s71_s16), 0 }
  0x62   : > { %3495 = sst [smem:[#allocation31_spill]] %s2548_s28  ;;  %s3586_s17 = smov (!%p72_p7, %s74_s17), %s2572_s12 }
  0x63   : > { %3496 = sst [smem:[#allocation32_spill]] %s2552_s29  ;;  %p100_p8 = scmp.ne.s32.totalorder %s2552_s29, %s2548_s28 }
  0x64   : > { %3497 = sst [smem:[#allocation33_spill]] %s2556_s2  ;;  %p76_p9 = scmp.ge.s32.totalorder %s3586_s17, 8 }
  0x65   : > { %3498 = sst [smem:[#allocation34_spill]] %s2560_s3  ;;  %p101_p10 = scmp.eq.s32.totalorder %s2580_s14, 0 }
  0x66   : > { %3499 = sst [smem:[#allocation35_spill]] %s2564_s30  ;;  %s3588_s17 = smov (%p76_p9, %s3586_s17), 0 }
  0x67   : > { %3500 = sst [smem:[#allocation36_spill]] %s2576_s13  ;;  %s3590_s4 = smov (!%p76_p9, %s78_s4), %s2576_s13 }
  0x68   : > { %s2769_s5 = sld [smem:[#allocation4 + %s2572_s12]]  ;;  %p80_p11 = scmp.ge.s32.totalorder %s3590_s4, 2 }
  0x69   : > { %s2772_s18 = sld [smem:[#allocation9 + %s2572_s12]]  ;;  %p2792_p12 = por %p101_p10, %p100_p8 }
  0x6a   : > { %3501 = sst [smem:[#allocation37_spill]] %s3584_s16  ;;  %s3592_s4 = smov (%p80_p11, %s3590_s4), 0 }
  0x6b   : > { %s116_s20 = sld [smem:[#allocation5 + %s2572_s12]]  ;;  %s2803_s9 = ssub.s32 %s2576_s13, %s3592_s4 }
  0x6c   : > { %s117_s21 = sld [smem:[#allocation9 + %s2572_s12]]  ;;  %p136_p13 = scmp.ne.s32.totalorder %s2544_s27, %s2540_s26 }
  0x6d   : > { %3502 = sst [smem:[#allocation38_spill]] %s3588_s17  ;;  %p142_p0 = scmp.ne.s32.totalorder %s2540_s26, %s2536_s25 }
  0x6e   : > { %s85_s15 = sld [smem:[#allocation4 + %s3588_s17]]  ;;  %p2814_p1 = por %p136_p13, %p101_p10 }
  0x6f   : > { %s84_s19 = smul.u32 %s2568_s11, %s2772_s18  ;;  %s86_s10 = sld [smem:[#allocation9 + %s3588_s17]] }
  0x70   : > { %s3503_s30 = scalar_select %p2792_p12, 1, 0 }
  0x71   : > { %s119_s2 = sld [smem:[#allocation5 + %s3588_s17]]  ;;  %s129_s18 = sadd.s32 1, %s2544_s27 }
  0x72   : > { %3504 = sst [smem:[#allocation39_spill]] %s3503_s30  ;;  %s118_s3 = smul.u32 %s2568_s11, %s117_s21 }
  0x73   : > { %3505 = sst [smem:[#allocation40_spill]] %s3592_s4  ;;  %p166_p6 = scmp.ne.s32.totalorder %s2532_s24, %s2528_s23 }
  0x74   : > { %s120_s28 = sld [smem:[#allocation9 + %s3588_s17]]  ;;  %s88_s8 = ssub.s32 %s2769_s5, %s85_s15 }
  0x75   : > { %s87_s7 = smul.u32 %s86_s10, %s3584_s16  ;;  %s3508_s5 = sadd.s32 4294967295, %s2580_s14  }
  0x76   : > { %s3506_s21 = scalar_select %p2814_p1, 1, 0 }
  0x77   : > { %s122_s30 = ssub.s32 %s116_s20, %s119_s2  ;;  %s89_s4 = ssub.s32 %s84_s19, %s87_s7 }
  0x78   : > { %3507 = sst [smem:[#allocation41_spill]] %s3506_s21  ;;  %s124_s13 = sor.u32 %s2803_s9, %s122_s30 }
  0x79   : > { %s90_s15 = sor.u32 %s89_s4, %s88_s8  ;;  %p2822_p3 = scmp.eq.s32.totalorder %s3508_s5, 0 }
  0x7a   : > { %s121_s10 = smul.u32 %s120_s28, %s3584_s16  ;;  %p91_p2 = scmp.eq.s32.totalorder %s90_s15, 0 }
  0x7b   : > { %s152_s21 = sld [smem:[#allocation10 + %s2572_s12]]  ;;  %s3510_s7 = sadd.s32 1, %s2552_s29 }
  0x7c   : > { %s125_s20 = ssub.s32 %s118_s3, %s121_s10  ;;  %p2837_p4 = por %p2822_p3, %p142_p0 }
  0x7d   : > { %s2830_s30 = scalar_select %p91_p2, %s2552_s29, %s3510_s7  }
  0x7e   : > { %s126_s8 = sor.u32 %s125_s20, %s124_s13  ;;  %s153_s4 = sld [smem:[#allocation10 + %s3588_s17]] }
  0x7f   : > { %3511 = sst [smem:[#allocation42_spill]] %s2830_s30  ;;  %p127_p5 = scmp.eq.s32.totalorder %s126_s8, 0 }
  0x80   : > { %s3512_s28 = scalar_select %p2837_p4, 1, 0 }
  0x81   : > { %s1480_s3 = sadd.s32 4294967294, %s2580_s14   ;;  %p2850_p7 = por %p166_p6, %p101_p10 }
  0x82   : > { %s2846_s19 = scalar_select %p127_p5, %s2544_s27, %s129_s18  }
  0x83   : > { %p172_p8 = scmp.ne.s32.totalorder %s2528_s23, %s2524_s22  ;;  %s182_s25 = sld [smem:[#allocation4 + %s2572_s12]] }
  0x84   : > { %3513 = sst [smem:[#allocation43_spill]] %s2846_s19  ;;  %s159_s10 = sadd.s32 1, %s2532_s24 }
  0x85   : > { %s183_s13 = sld [smem:[#allocation4 + %s3588_s17]]  ;;  %p2861_p9 = por %p172_p8, %p2822_p3 }
  0x86   : > { %s154_s20 = ssub.s32 %s152_s21, %s153_s4  ;;  %p199_p11 = scmp.ne.s32.totalorder %s2520_s1, %s2516_s0 }
  0x87   : > { %s3515_s5 = scalar_select %p2861_p9, 1, 0 }
  0x88   : > { %s156_s18 = sor.u32 %s154_s20, %s2803_s9  ;;  %s3517_s7 = sadd.s32 4294967295, %s2580_s14  }
  0x89   : > { %3516 = sst [smem:[#allocation44_spill]] %s3515_s5  ;;  %p200_p10 = scmp.eq.s32.totalorder %s3517_s7, 31 }
  0x8a   : > { %p157_p13 = scmp.eq.s32.totalorder %s156_s18, 0  ;;  %p205_p0 = scmp.ne.s32.totalorder %s2516_s0, %s2512_s6 }
  0x8b   : > { %p2872_p2 = por %p200_p10, %p199_p11  ;;  %p206_p5 = scmp.eq.s32.totalorder %s1480_s3, 31 }
  0x8c   : > { %s2877_s8 = scalar_select %p157_p13, %s2532_s24, %s159_s10  }
  0x8d   : > { %s3518_s22 = scalar_select %p2872_p2, 1, 0 }
  0x8e   : > { %3520 = sst [smem:[#allocation46_spill]] %s2877_s8  ;;  %s184_s2 = ssub.s32 %s182_s25, %s183_s13 }
  0x8f   : > { %3519 = sst [smem:[#allocation45_spill]] %s3518_s22  ;;  %p2879_p6 = por %p206_p5, %p205_p0 }
  0x90   : > { %s186_s16 = sor.u32 %s184_s2, %s2803_s9  ;;  %s189_s21 = sadd.s32 1, %s2520_s1 }
  0x91   : > { %s3521_s17 = scalar_select %p2879_p6, 1, 0 }
  0x92   : > { %p187_p3 = scmp.eq.s32.totalorder %s186_s16, 0  ;;  %p1482_p8 = scmp.ge.s32.totalorder %s2580_s14, 32 }
  0x93   : > { %3522 = sst [smem:[#allocation47_spill]] %s3521_s17 }
  0x94   : > { %s2886_s4 = scalar_select %p187_p3, %s2520_s1, %s189_s21  }
  0x95   : > { %222 = sbr.rel (%p1482_p8) target bundleno = 245 (0xf5), region = 16 }
  0x96   : > { %3523 = sst [smem:[#allocation48_spill]] %s2886_s4 }
  0x9c   : > { %225 = sbr.rel (!%p2792_p12) target bundleno = 171 (0xab), region = 20  ;;  %s230_s3 = sld [smem:[#allocation4 + %s2572_s12]] (%p2792_p12) }
  0x9d   : > { %s231_s25 = sld [smem:[#allocation9 + %s2572_s12]] (%p2792_p12)  ;;  %s227_s13 = sand.u32 (%p2792_p12), 1, %s2552_s29  }
  0x9e   : > { %s1483_s18 = sshll.u32 (%p2792_p12), %s227_s13, 5  ;;  %s3525_s30 = sld [smem:[#allocation49_spill]] (%p2792_p12) }
  0x9f   : > { %s229_s20 = scalar_lea.vmem (%p2792_p12), [#allocation11], %s1483_s18 }
  0xa2   : > { %s1516_s10 = sshll.u32 (%p2792_p12), %s230_s3, 3 }
  0xa3   : > { %s232_s9 = smul.u32 %s2568_s11, %s231_s25 }
  0xa5   : > { %s235_s7 = sadd.s32 %s1516_s10, %s232_s9 }
  0xa6   : > { %s1486_s16 = sshll.u32 %s235_s7, 3 }
  0xa7   : > { %s237_s19 = scalar_lea.vmem %s3525_s30, %s1486_s16 }
  0xa8   : > { %v271_v0 = vld [vmem:[%s237_s19] sm:$0xff]  ;;  %v273_v1 = vld [vmem:[%s237_s19 + $0x10] sm:$0xff] }
  0xa9   : > { %v275_v2 = vld [vmem:[%s237_s19 + $0x20] sm:$0xff]  ;;  %272 = vst [vmem:[%s229_s20] sm:$0xff] %v271_v0  ;;  %274 = vst [vmem:[%s229_s20 + $0x8] sm:$0xff] %v273_v1  ;;  %v277_v3 = vld [vmem:[%s237_s19 + $0x30] sm:$0xff] }
  0xaa   : > { %276 = vst [vmem:[%s229_s20 + $0x10] sm:$0xff] %v275_v2  ;;  %278 = vst [vmem:[%s229_s20 + $0x18] sm:$0xff] %v277_v3 }
  0xab PF: > { %s3527_s25 = sld [smem:[#allocation36_spill]]  ;;  %s285_s30 = sand.u32 1, %s2544_s27  }
  0xac   : > { %s1487_s13 = sshll.u32 %s285_s30, 7  ;;  %s313_s4 = sand.u32 1, %s2532_s24  }
  0xad   : > { %s2080_s10 = scalar_select %p2814_p1, [#allocation5], [#allocation18] }
  0xae   : > { %s2081_s18 = scalar_select %p2814_p1, %s2572_s12, 0 }
  0xaf   : > { %s2082_s19 = scalar_select %p2814_p1, [#allocation9], [#allocation19] }
  0xb0   : > { %s290_s9 = sld [smem:[%s2080_s10 + %s2081_s18]]  ;;  %s289_s16 = scalar_lea.vmem [#allocation12], %s1487_s13 }
  0xb1   : > { %s291_s7 = sld [smem:[%s2082_s19 + %s2081_s18]]  ;;  %s303_s2 = sshll.u32 %s289_s16, 4  ;;  %s2907_s2 = int_to_ptr.vmem [resolvable:$true] %s303_s2 }
  0xb2   : > { %s1517_s21 = sshll.u32 %s3527_s25, 5  ;;  %s3528_s0 = sld [smem:[#allocation50_spill]] }
  0xb3   : > { %s2085_s27 = scalar_select %p2850_p7, [#allocation10], [#allocation20] }
  0xb4   : > { %s2920_s13 = sshll.u32 %s313_s4, 5  ;;  %s2922_s10 = scalar_lea.sflag [#allocation13], %s285_s30 }
  0xb6   : > { %s1490_s29 = sshll.u32 %s290_s9, 6 }
  0xb7   : > { %s292_s20 = smul.u32 %s2568_s11, %s291_s7 }
  0xb8   : > { %s3529_s5 = smov %s3528_s0 }
  0xb9   : > { %s298_s8 = sadd.s32 %s1517_s21, %s292_s20  ;;  %s2344_s6 = scalar_lea.hbm %s3529_s5, 32768 }
  0xba   : > { %s300_s1 = sadd.s32 %s1490_s29, %s298_s8 }
  0xbb   : > { %s1491_s17 = sshll.u32 %s300_s1, 7 }
  0xbc   : > { %s2916_s23 = scalar_lea.hbm %s3528_s0, %s1491_s17 }
  0xbd   : > { %s2340_s18 = scalar_lea.hbm %s2916_s23, 2048  ;;  %p2345_p13 = scmp.lt.u32.totalorder %s2916_s23, %s3529_s5 }
  0xbe   : > { %p2341_p12 = scmp.ne.s32.totalorder %s2916_s23, %s2340_s18  ;;  %p2346_p0 = scmp.lt.u32.totalorder %s2344_s6, %s2340_s18 }
  0xbf   : > { %p2348_p3 = scmp.lt.u32.totalorder %s2340_s18, %s2916_s23 }
  0xc0   : > { %p2342_p11 = pnand %p2341_p12, %p2814_p1  ;;  %p2347_p5 = por %p2346_p0, %p2345_p13 }
  0xc2   : > { %p2343_p10 = pneg %p2342_p11  ;;  %p2349_p8 = por %p2348_p3, %p2347_p5 }
  0xc4   : > { %p2350_p6 = pnand %p2349_p8, %p2343_p10 }
  0xc6   : > { %2353 = shalt.err (!%p2350_p6)
}
  0xc7   : > { %s2354_s22 = scalar_lea.vmem %s2907_s2, 2048  ;;  %s2589_s8 = smov [#allocation12]  }
  0xc8   : > { %p2355_p12 = scmp.ne.s32.totalorder %s2907_s2, %s2354_s22  ;;  %s2358_s30 = sshll.u32 %s2589_s8, 4  ;;  %s2359_s30 = int_to_ptr.vmem [resolvable:$false] %s2358_s30 }
  0xc9   : > { %s2360_s19 = scalar_lea.vmem %s2359_s30, 4096  ;;  %p2361_p9 = scmp.lt.s32.totalorder %s2907_s2, %s2359_s30 }
  0xca   : > { %p2356_p11 = pnand %p2355_p12, %p2814_p1  ;;  %p2362_p4 = scmp.lt.s32.totalorder %s2360_s19, %s2354_s22 }
  0xcc   : > { %p2357_p2 = pneg %p2356_p11  ;;  %p2363_p13 = por %p2362_p4, %p2361_p9 }
  0xce   : > { %p2364_p0 = pnand %p2363_p13, %p2357_p2 }
  0xd0   : > { %2367 = shalt.err (!%p2364_p0)
}
  0xd1   : > { %s2590_s9 = smov 256   ;;  %s2591_s7 = smov 128  }
  0xd2   : > { %s2592_s16 = smov 8   ;;  %s317_s18 = scalar_lea.vmem [#allocation15], %s2920_s13 }
  0xd3   : > { %2084 = dma.hbm_to_vmem [thread:$0]  (%p2814_p1), %s2916_s23, 2048, %s2907_s2, %s2922_s10, %s2590_s9, %s2591_s7, %s2592_s16  }
  0xd4   : > { %s2086_s21 = scalar_select %p2850_p7, %s2572_s12, 0 }
  0xd5   : > { %s327_s1 = sshll.u32 %s317_s18, 4  ;;  %s3530_s8 = sld [smem:[#allocation51_spill]]  ;;  %s2957_s1 = int_to_ptr.vmem [resolvable:$true] %s327_s1 }
  0xd6   : > { %s318_s20 = sld [smem:[%s2085_s27 + %s2086_s21]]  ;;  %s2966_s23 = scalar_lea.sflag [#allocation16], %s313_s4 }
  0xdb   : > { %s2372_s13 = scalar_lea.hbm %s3530_s8, 4096 }
  0xdc   : > { %s1518_s29 = sshll.u32 %s318_s20, 3 }
  0xdd   : > { %s324_s6 = sadd.s32 %s3527_s25, %s1518_s29 }
  0xde   : > { %s1495_s0 = sshll.u32 %s324_s6, 7 }
  0xdf   : > { %s2962_s3 = scalar_lea.hbm %s3530_s8, %s1495_s0 }
  0xe0   : > { %s2368_s27 = scalar_lea.hbm %s2962_s3, 512  ;;  %p2373_p2 = scmp.lt.u32.totalorder %s2962_s3, %s3530_s8 }
  0xe1   : > { %p2369_p1 = scmp.ne.s32.totalorder %s2962_s3, %s2368_s27  ;;  %p2374_p6 = scmp.lt.u32.totalorder %s2372_s13, %s2368_s27 }
  0xe2   : > { %p2376_p5 = scmp.lt.u32.totalorder %s2368_s27, %s2962_s3 }
  0xe3   : > { %p2370_p4 = pnand %p2369_p1, %p2850_p7  ;;  %p2375_p10 = por %p2374_p6, %p2373_p2 }
  0xe5   : > { %p2371_p9 = pneg %p2370_p4  ;;  %p2377_p3 = por %p2376_p5, %p2375_p10 }
  0xe7   : > { %p2378_p8 = pnand %p2377_p3, %p2371_p9 }
  0xe9   : > { %2381 = shalt.err (!%p2378_p8)
}
  0xea   : > { %s2382_s4 = scalar_lea.vmem %s2957_s1, 512  ;;  %s2593_s19 = smov [#allocation15]  }
  0xeb   : > { %p2383_p12 = scmp.ne.s32.totalorder %s2957_s1, %s2382_s4  ;;  %s2386_s21 = sshll.u32 %s2593_s19, 4  ;;  %s2387_s21 = int_to_ptr.vmem [resolvable:$false] %s2386_s21 }
  0xec   : > { %s2388_s20 = scalar_lea.vmem %s2387_s21, 1024  ;;  %p2389_p0 = scmp.lt.s32.totalorder %s2957_s1, %s2387_s21 }
  0xed   : > { %p2384_p11 = pnand %p2383_p12, %p2850_p7  ;;  %p2390_p1 = scmp.lt.s32.totalorder %s2388_s20, %s2382_s4 }
  0xef   : > { %p2385_p13 = pneg %p2384_p11  ;;  %p2391_p4 = por %p2390_p1, %p2389_p0 }
  0xf1   : > { %p2392_p2 = pnand %p2391_p4, %p2385_p13 }
  0xf3   : > { %2395 = shalt.err (!%p2392_p2)
}
  0xf4   : > { %2087 = dma.hbm_to_vmem [thread:$0]  (%p2850_p7), %s2962_s3, 512, %s2957_s1, %s2966_s23, %s2590_s9, %s2591_s7, %s2592_s16  }
  0xf5 PF: > { %p1496_p9 = scmp.ge.s32.totalorder %s2580_s14, 1  ;;  %p335_p6 = scmp.lt.s32.totalorder %s2580_s14, 33 }
  0xf7   : > { %p336_p10 = pnand %p1496_p9, %p335_p6 }
  0xf8   : > { %s3531_s18 = sld [smem:[#allocation31_spill]] (!%p336_p10)  ;;  %s348_s6 = sand.u32 (!%p336_p10), 1, %s2540_s26  }
  0xf9   : > { %339 = sbr.rel (%p336_p10) target bundleno = 811 (0x32b), region = 66  ;;  %s1498_s0 = sshll.u32 (!%p336_p10), %s348_s6, 7 }
  0xfa   : > { %s349_s22 = scalar_lea.sflag (!%p336_p10), [#allocation13], %s348_s6  ;;  %s2999_s27 = scalar_lea.vmem (!%p336_p10), [#allocation12], %s1498_s0 }
  0xfb   : > { %p3532_p7 = scmp.ne.s32.totalorder (!%p336_p10), %s3512_s28, 0 }
  0xfe   : > { %s342_s29 = sand.u32 (!%p336_p10), 1, %s3531_s18  }
  0xff   : > { %s1497_s15 = sshll.u32 (!%p336_p10), %s342_s29, 5 }
 0x100   : > { %s2997_s17 = scalar_lea.vmem [#allocation11], %s1497_s15 }
 0x101   : > { %2499 = dma.done.wait (%p3532_p7), %s349_s22, 2048  }
 0x102   : > { %2501 = vsyncadd (%p3532_p7), %s349_s22, 4294965248  ;;  %s3533_s9 = sld [smem:[#allocation29_spill]]  ;;  %s3534_s7 = sld [smem:[#allocation44_spill]] }
 0x108   : > { %s357_s16 = sand.u32 1, %s3533_s9   ;;  %p3535_p5 = scmp.ne.s32.totalorder %s3534_s7, 0 }
 0x109   : > { %s1499_s1 = sshll.u32 %s357_s16, 5  ;;  %s358_s3 = scalar_lea.sflag [#allocation16], %s357_s16 }
 0x10a   : > { %s3006_s23 = scalar_lea.vmem [#allocation15], %s1499_s1 }
 0x10b   : > { %2503 = dma.done.wait (%p3535_p5), %s358_s3, 512  }
 0x10c   : > { %2505 = vsyncadd (%p3535_p5), %s358_s3, 4294966784  ;;  %s3536_s25 = sld [smem:[#allocation27_spill]] }
 0x10d   : > { %s3537_s2 = sld [smem:[#allocation34_spill]] }
 0x112   : > { %s390_s13 = sand.u32 1, %s3536_s25  }
 0x113   : > { %s405_s10 = sld [smem:[#allocation9 + %s3537_s2]]  ;;  %s1500_s28 = sshll.u32 %s390_s13, 5 }
 0x114   : > { %s3016_s30 = scalar_lea.vmem [#allocation17], %s1500_s28 }
 0x119   : > { %p1501_p3 = scmp.ne.s32.totalorder %s405_s10, 1 }
 0x11a   : > { %v414_v4 = vld [vmem:[%s2999_s27] sm:$0xff] (!%p1501_p3)  ;;  %v415_v5 = vld [vmem:[%s2999_s27 + $0x8] sm:$0xff] (!%p1501_p3)  ;;  %v416_v6 = vld [vmem:[%s2999_s27 + $0x10] sm:$0xff] (!%p1501_p3)  ;;  %s3538_s4 = sld [smem:[#allocation33_spill]] (!%p1501_p3) }
 0x11b   : > { %409 = sbr.rel (%p1501_p3) target bundleno = 776 (0x308), region = 82  ;;  %v431_v7 = vand.u32 (!%p1501_p3), 4294901760, %v414_v4  ;;  %v434_v8 = vand.u32 (!%p1501_p3), 4294901760, %v415_v5  ;;  %v417_v9 = vld [vmem:[%s2999_s27 + $0x18] sm:$0xff] (!%p1501_p3)  ;;  %v437_v10 = vand.u32 (!%p1501_p3), 4294901760, %v416_v6  ;;  %v418_v14 = vld [vmem:[%s2999_s27 + $0x20] sm:$0xff] (!%p1501_p3) }
 0x11c   : > { %v440_v11 = vand.u32 (!%p1501_p3), 4294901760, %v417_v9  ;;  %v419_v15 = vld [vmem:[%s2999_s27 + $0x28] sm:$0xff] (!%p1501_p3)  ;;  %v410_v16 = vld [vmem:[%s2997_s17] sm:$0xff] (!%p1501_p3)  ;;  %v443_v18 = vand.u32 (!%p1501_p3), 4294901760, %v418_v14  ;;  %v420_v23 = vld [vmem:[%s2999_s27 + $0x30] sm:$0xff] (!%p1501_p3) }
 0x11d   : > { %v3022_v12 = vpack.c.bf16 (!%p1501_p3), %v434_v8, %v431_v7  ;;  %v3033_v17 = vand.u32 (!%p1501_p3), 4294901760, %v410_v16  ;;  %v446_v19 = vand.u32 (!%p1501_p3), 4294901760, %v419_v15  ;;  %v421_v24 = vld [vmem:[%s2999_s27 + $0x38] sm:$0xff] (!%p1501_p3)  ;;  %v449_v27 = vand.u32 (!%p1501_p3), 4294901760, %v420_v23  ;;  %v422_v30 = vld [vmem:[%s2999_s27 + $0x40] sm:$0xff] (!%p1501_p3)  ;;  %v423_v31 = vld [vmem:[%s2999_s27 + $0x48] sm:$0xff] (!%p1501_p3) }
 0x11e   : > { %v3024_v13 = vpack.c.bf16 (!%p1501_p3), %v440_v11, %v437_v10  ;;  %v452_v28 = vand.u32 (!%p1501_p3), 4294901760, %v421_v24  ;;  %v455_v32 = vand.u32 (!%p1501_p3), 4294901760, %v422_v30  ;;  %v458_v33 = vand.u32 (!%p1501_p3), 4294901760, %v423_v31  ;;  %v424_v37 = vld [vmem:[%s2999_s27 + $0x50] sm:$0xff] (!%p1501_p3)  ;;  %v425_v38 = vld [vmem:[%s2999_s27 + $0x58] sm:$0xff] (!%p1501_p3)  ;;  %v426_v55 = vld [vmem:[%s2999_s27 + $0x60] sm:$0xff] (!%p1501_p3) }
 0x11f   : > { %1869 = vmatprep.subr.bf16.mxu1 (!%p1501_p3), %v3022_v12  ;;  %1965 = vmatprep.subr.bf16.mxu0 (!%p1501_p3), %v3022_v12  ;;  %v3038_v20 = vsub.f32 (!%p1501_p3), %v410_v16, %v3033_v17  ;;  %v3041_v22 = vpack.c.bf16 (!%p1501_p3), %v446_v19, %v443_v18  ;;  %v3060_v35 = vsub.f32 (!%p1501_p3), %v414_v4, %v431_v7  ;;  %v461_v49 = vand.u32 (!%p1501_p3), 4294901760, %v424_v37  ;;  %v427_v56 = vld [vmem:[%s2999_s27 + $0x68] sm:$0xff] (!%p1501_p3)  ;;  %v428_v63 = vld [vmem:[%s2999_s27 + $0x70] sm:$0xff] (!%p1501_p3)  ;;  %v429_v0 = vld [vmem:[%s2999_s27 + $0x78] sm:$0xff] (!%p1501_p3) }
 0x120   : > { %1871 = vmatpush3.bf16.xpose.msra.mxu1 (!%p1501_p3), %v3022_v12  ;;  %1967 = vmatpush3.bf16.xpose.msra.mxu0 (!%p1501_p3), %v3022_v12  ;;  %v3050_v29 = vpack.c.bf16 (!%p1501_p3), %v452_v28, %v449_v27  ;;  %v3058_v34 = vpack.c.bf16 (!%p1501_p3), %v458_v33, %v455_v32  ;;  %v3062_v36 = vsub.f32 (!%p1501_p3), %v415_v5, %v434_v8  ;;  %v464_v50 = vand.u32 (!%p1501_p3), 4294901760, %v425_v38  ;;  %v411_v3 = vld [vmem:[%s2997_s17 + $0x8] sm:$0xff] (!%p1501_p3)  ;;  %p1502_p8 = scmp.ne.s32.totalorder (!%p1501_p3), %s3538_s4, 0 }
 0x121   : > { %1873 = vmatprep.subr.bf16.mxu1 (!%p1501_p3), %v3024_v13  ;;  %1969 = vmatprep.subr.bf16.mxu0 (!%p1501_p3), %v3024_v13  ;;  %v513_v21 = vand.u32 (!%p1501_p3), 4294901760, %v3038_v20  ;;  %v3066_v39 = vsub.f32 (!%p1501_p3), %v416_v6, %v437_v10  ;;  %v3068_v40 = vsub.f32 (!%p1501_p3), %v417_v9, %v440_v11  ;;  %v3070_v41 = vsub.f32 (!%p1501_p3), %v418_v14, %v443_v18  ;;  %v412_v10 = vld [vmem:[%s2997_s17 + $0x10] sm:$0xff] (!%p1501_p3)  ;;  %v413_v11 = vld [vmem:[%s2997_s17 + $0x18] sm:$0xff] (!%p1501_p3) }
 0x122   : > { %v3072_v42 = vsub.f32 %v419_v15, %v446_v19  ;;  %v3074_v43 = vsub.f32 %v420_v23, %v449_v27  ;;  %v3076_v44 = vsub.f32 %v421_v24, %v452_v28  ;;  %v3080_v45 = vpack.c.bf16 %v3062_v36, %v3060_v35 }
 0x123   : > { %v514_v25 = vsub.f32 %v3038_v20, %v513_v21  ;;  %1786 = vmatprep.mubr.f32.mxu0 %v513_v21  ;;  %v3084_v46 = vsub.f32 %v422_v30, %v455_v32  ;;  %v3086_v47 = vsub.f32 %v423_v31, %v458_v33  ;;  %v3090_v48 = vpack.c.bf16 %v3068_v40, %v3066_v39 }
 0x124   : > { %v3096_v51 = vpack.c.bf16 %v3072_v42, %v3070_v41  ;;  %v3100_v52 = vpack.c.bf16 %v3076_v44, %v3074_v43  ;;  %v3106_v54 = vpack.c.bf16 %v464_v50, %v461_v49  ;;  %v3110_v57 = vsub.f32 %v424_v37, %v461_v49 }
 0x125   : > { %v515_v26 = vand.u32 4294901760, %v514_v25  ;;  %v3104_v53 = vpack.c.bf16 %v3086_v47, %v3084_v46  ;;  %v3112_v58 = vsub.f32 %v425_v38, %v464_v50  ;;  %v467_v60 = vand.u32 4294901760, %v426_v55 }
 0x126   : > { %v470_v61 = vand.u32 4294901760, %v427_v56  ;;  %v473_v5 = vand.u32 4294901760, %v428_v63  ;;  %v476_v6 = vand.u32 4294901760, %v429_v0  ;;  %v554_v7 = vand.u32 4294901760, %v3060_v35 }
 0x127   : > { %1672 = vmatprep.mubr.f32.mxu1 %v515_v26  ;;  %v3118_v59 = vpack.c.bf16 %v3112_v58, %v3110_v57  ;;  %v3126_v1 = vsub.f32 %v426_v55, %v467_v60  ;;  %v561_v8 = vand.u32 4294901760, %v3062_v36  ;;  %v3141_v9 = vand.u32 4294901760, %v411_v3 }
 0x128   : > { %1875 = vmatpush3.bf16.xpose.msra.mxu1 %v3024_v13  ;;  %1971 = vmatpush3.bf16.xpose.msra.mxu0 %v3024_v13  ;;  %v3122_v62 = vpack.c.bf16 %v470_v61, %v467_v60  ;;  %v3128_v2 = vsub.f32 %v427_v56, %v470_v61  ;;  %v3145_v14 = vpack.c.bf16 %v476_v6, %v473_v5  ;;  %v3153_v21 = vand.u32 4294901760, %v412_v10 }
 0x129   : > { %1877 = vmatprep.subr.bf16.mxu1 %v3041_v22  ;;  %1973 = vmatprep.subr.bf16.mxu0 %v3041_v22  ;;  %v555_v15 = vsub.f32 %v3060_v35, %v554_v7  ;;  %v562_v16 = vsub.f32 %v3062_v36, %v561_v8  ;;  %v3149_v18 = vsub.f32 %v428_v63, %v473_v5  ;;  %v3158_v24 = vand.u32 4294901760, %v413_v11 }
 0x12a   : > { %v3135_v4 = vpack.c.bf16 %v3128_v2, %v3126_v1  ;;  %v3151_v19 = vsub.f32 %v429_v0, %v476_v6  ;;  %v3156_v23 = vsub.f32 %v411_v3, %v3141_v9  ;;  %v568_v28 = vand.u32 4294901760, %v3066_v39 }
 0x12b   : > { %v556_v26 = vand.u32 4294901760, %v555_v15  ;;  %v563_v27 = vand.u32 4294901760, %v562_v16  ;;  %v575_v30 = vand.u32 4294901760, %v3068_v40  ;;  %v3171_v31 = vsub.f32 %v412_v10, %v3153_v21 }
 0x12c   : > { %v3164_v25 = vpack.c.bf16 %v3151_v19, %v3149_v18  ;;  %v523_v32 = vand.u32 4294901760, %v3156_v23  ;;  %v3175_v33 = vsub.f32 %v413_v11, %v3158_v24  ;;  %v1996_v36 = vpack.c.bf16 %v561_v8, %v554_v7 }
 0x12d   : > { %v1900_v35 = vpack.c.bf16 %v563_v27, %v556_v26  ;;  %v569_v37 = vsub.f32 %v3066_v39, %v568_v28  ;;  %v576_v38 = vsub.f32 %v3068_v40, %v575_v30  ;;  %v533_v49 = vand.u32 4294901760, %v3171_v31 }
 0x12e   : > { %v524_v50 = vsub.f32 %v3156_v23, %v523_v32  ;;  %v543_v55 = vand.u32 4294901760, %v3175_v33  ;;  %v582_v61 = vand.u32 4294901760, %v3070_v41  ;;  %v589_v39 = vand.u32 4294901760, %v3072_v42 }
 0x12f   : > { %v570_v56 = vand.u32 4294901760, %v569_v37  ;;  %v577_v60 = vand.u32 4294901760, %v576_v38  ;;  %v534_v40 = vsub.f32 %v3171_v31, %v533_v49  ;;  %v2000_v5 = vpack.c.bf16 %v575_v30, %v568_v28 }
 0x130   : > { %1879 = vmatpush3.bf16.xpose.msra.mxu1 %v3041_v22  ;;  %1975 = vmatpush3.bf16.xpose.msra.mxu0 %v3041_v22  ;;  %v525_v63 = vand.u32 4294901760, %v524_v50  ;;  %v544_v0 = vsub.f32 %v3175_v33, %v543_v55  ;;  %v583_v6 = vsub.f32 %v3070_v41, %v582_v61  ;;  %v590_v7 = vsub.f32 %v3072_v42, %v589_v39 }
 0x131   : > { %1881 = vmatprep.subr.bf16.mxu1 %v3050_v29  ;;  %1977 = vmatprep.subr.bf16.mxu0 %v3050_v29  ;;  %v1904_v3 = vpack.c.bf16 %v577_v60, %v570_v56  ;;  %v535_v8 = vand.u32 4294901760, %v534_v40  ;;  %v596_v16 = vand.u32 4294901760, %v3074_v43  ;;  %v603_v26 = vand.u32 4294901760, %v3076_v44 }
 0x132   : > { %v545_v10 = vand.u32 4294901760, %v544_v0  ;;  %v584_v11 = vand.u32 4294901760, %v583_v6  ;;  %v591_v15 = vand.u32 4294901760, %v590_v7  ;;  %v2004_v42 = vpack.c.bf16 %v589_v39, %v582_v61 }
 0x133   : > { %v597_v27 = vsub.f32 %v3074_v43, %v596_v16  ;;  %v604_v28 = vsub.f32 %v3076_v44, %v603_v26  ;;  %v2008_v38 = vpack.c.bf16 %v603_v26, %v596_v16  ;;  %v631_v56 = vand.u32 4294901760, %v3112_v58 }
 0x134   : > { %v1908_v41 = vpack.c.bf16 %v591_v15, %v584_v11  ;;  %v645_v0 = vand.u32 4294901760, %v3128_v2 }
 0x135   : > { %v598_v30 = vand.u32 4294901760, %v597_v27  ;;  %v632_v40 = vsub.f32 %v3112_v58, %v631_v56 }
 0x136   : > { %v646_v7 = vsub.f32 %v3128_v2, %v645_v0 }
 0x138   : > { %1883 = vmatpush3.bf16.xpose.msra.mxu1 %v3050_v29  ;;  %1979 = vmatpush3.bf16.xpose.msra.mxu0 %v3050_v29  ;;  %v647_v58 = vand.u32 4294901760, %v646_v7 }
 0x139   : > { %1885 = vmatprep.subr.bf16.mxu1 %v3058_v34  ;;  %1981 = vmatprep.subr.bf16.mxu0 %v3058_v34 }
 0x140   : > { %1887 = vmatpush3.bf16.xpose.msra.mxu1 %v3058_v34  ;;  %1983 = vmatpush3.bf16.xpose.msra.mxu0 %v3058_v34 }
 0x141   : > { %1889 = vmatprep.subr.bf16.mxu1 %v3106_v54  ;;  %1985 = vmatprep.subr.bf16.mxu0 %v3106_v54 }
 0x148   : > { %1891 = vmatpush3.bf16.xpose.msra.mxu1 %v3106_v54  ;;  %1987 = vmatpush3.bf16.xpose.msra.mxu0 %v3106_v54 }
 0x149   : > { %1893 = vmatprep.subr.bf16.mxu1 %v3122_v62  ;;  %1989 = vmatprep.subr.bf16.mxu0 %v3122_v62 }
 0x150   : > { %1895 = vmatpush3.bf16.xpose.msra.mxu1 %v3122_v62  ;;  %1991 = vmatpush3.bf16.xpose.msra.mxu0 %v3122_v62 }
 0x151   : > { %1897 = vmatprep.subr.bf16.mxu1 %v3145_v14  ;;  %1993 = vmatprep.subr.bf16.mxu0 %v3145_v14 }
 0x158   : > { %1899 = vmatpush3.bf16.xpose.msra.mxu1 %v3145_v14  ;;  %1995 = vmatpush3.bf16.xpose.msra.mxu0 %v3145_v14 }
 0x159   : > { %1901 = vmatprep.subr.bf16.mxu1 %v1900_v35  ;;  %1997 = vmatprep.subr.bf16.mxu0 %v1996_v36 }
 0x15f   : > { %1673 = vmatmul.mubr.f32.vlgmr.msra.gmra.mrb[0].mxu1 %v525_v63  ;;  %1787 = vmatmul.mubr.f32.vlgmr.msra.gmra.mrb[0].mxu0 %v523_v32  ;;  %v605_v32 = vand.u32 4294901760, %v604_v28  ;;  %v638_v63 = vand.u32 4294901760, %v3126_v1 }
 0x160   : > { %1903 = vmatpush3.bf16.xpose.msra.mxu1 %v1900_v35  ;;  %1999 = vmatpush3.bf16.xpose.msra.mxu0 %v1996_v36  ;;  %v610_v35 = vand.u32 4294901760, %v3084_v46  ;;  %v617_v36 = vand.u32 4294901760, %v3086_v47 }
 0x161   : > { %1905 = vmatprep.subr.bf16.mxu1 %v1904_v3  ;;  %2001 = vmatprep.subr.bf16.mxu0 %v2000_v5  ;;  %v1912_v37 = vpack.c.bf16 %v605_v32, %v598_v30  ;;  %v639_v6 = vsub.f32 %v3126_v1, %v638_v63  ;;  %v2020_v15 = vpack.c.bf16 %v645_v0, %v638_v63 }
 0x162   : > { %1675 = vmatprep.mubr.f32.mxu1 %v535_v8  ;;  %1789 = vmatprep.mubr.f32.mxu0 %v533_v49  ;;  %v611_v49 = vsub.f32 %v3084_v46, %v610_v35  ;;  %v618_v50 = vsub.f32 %v3086_v47, %v617_v36  ;;  %v2012_v61 = vpack.c.bf16 %v617_v36, %v610_v35  ;;  %v633_v47 = vand.u32 4294901760, %v632_v40 }
 0x163   : > { %1676 = vmatmul.mubr.f32.gmra.mrb[2].mxu1 %v545_v10  ;;  %1790 = vmatmul.mubr.f32.gmra.mrb[2].mxu0 %v543_v55  ;;  %v624_v55 = vand.u32 4294901760, %v3110_v57  ;;  %v652_v8 = vand.u32 4294901760, %v3149_v18  ;;  %v659_v10 = vand.u32 4294901760, %v3151_v19 }
 0x164   : > { %1710 = vmatprep.mubr.f32.mxu1 %v3033_v17  ;;  %1824 = vmatprep.mubr.f32.mxu0 %v3033_v17  ;;  %v612_v43 = vand.u32 4294901760, %v611_v49  ;;  %v619_v44 = vand.u32 4294901760, %v618_v50 }
 0x165   : > { %v625_v39 = vsub.f32 %v3110_v57, %v624_v55  ;;  %v640_v57 = vand.u32 4294901760, %v639_v6  ;;  %v653_v16 = vsub.f32 %v3149_v18, %v652_v8  ;;  %v660_v26 = vsub.f32 %v3151_v19, %v659_v10 }
 0x166   : > { %v1916_v60 = vpack.c.bf16 %v619_v44, %v612_v43 }
 0x167   : > { %v626_v46 = vand.u32 4294901760, %v625_v39  ;;  %v1924_v11 = vpack.c.bf16 %v647_v58, %v640_v57  ;;  %v654_v1 = vand.u32 4294901760, %v653_v16  ;;  %v661_v2 = vand.u32 4294901760, %v660_v26 }
 0x168   : > { %1907 = vmatpush3.bf16.xpose.msra.mxu1 %v1904_v3  ;;  %2003 = vmatpush3.bf16.xpose.msra.mxu0 %v2000_v5  ;;  %v2016_v5 = vpack.c.bf16 %v631_v56, %v624_v55 }
 0x169   : > { %1909 = vmatprep.subr.bf16.mxu1 %v1908_v41  ;;  %2005 = vmatprep.subr.bf16.mxu0 %v2004_v42  ;;  %v1920_v3 = vpack.c.bf16 %v633_v47, %v626_v46 }
 0x170   : > { %1911 = vmatpush3.bf16.xpose.msra.mxu1 %v1908_v41  ;;  %2007 = vmatpush3.bf16.xpose.msra.mxu0 %v2004_v42  ;;  %v1928_v41 = vpack.c.bf16 %v661_v2, %v654_v1  ;;  %v2024_v42 = vpack.c.bf16 %v659_v10, %v652_v8 }
 0x171   : > { %1913 = vmatprep.subr.bf16.mxu1 %v1912_v37  ;;  %2009 = vmatprep.subr.bf16.mxu0 %v2008_v38 }
 0x178   : > { %1915 = vmatpush3.bf16.xpose.msra.mxu1 %v1912_v37  ;;  %2011 = vmatpush3.bf16.xpose.msra.mxu0 %v2008_v38 }
 0x179   : > { %1917 = vmatprep.subr.bf16.mxu1 %v1916_v60  ;;  %2013 = vmatprep.subr.bf16.mxu0 %v2012_v61 }
 0x180   : > { %1919 = vmatpush3.bf16.xpose.msra.mxu1 %v1916_v60  ;;  %2015 = vmatpush3.bf16.xpose.msra.mxu0 %v2012_v61 }
 0x181   : > { %1921 = vmatprep.subr.bf16.mxu1 %v1920_v3  ;;  %2017 = vmatprep.subr.bf16.mxu0 %v2016_v5 }
 0x188   : > { %1923 = vmatpush3.bf16.xpose.msra.mxu1 %v1920_v3  ;;  %2019 = vmatpush3.bf16.xpose.msra.mxu0 %v2016_v5 }
 0x189   : > { %1925 = vmatprep.subr.bf16.mxu1 %v1924_v11  ;;  %2021 = vmatprep.subr.bf16.mxu0 %v2020_v15 }
 0x190   : > { %1927 = vmatpush3.bf16.xpose.msra.mxu1 %v1924_v11  ;;  %2023 = vmatpush3.bf16.xpose.msra.mxu0 %v2020_v15 }
 0x191   : > { %1929 = vmatprep.subr.bf16.mxu1 %v1928_v41  ;;  %2025 = vmatprep.subr.bf16.mxu0 %v2024_v42 }
 0x198   : > { %1931 = vmatpush3.bf16.xpose.msra.mxu1 %v1928_v41  ;;  %2027 = vmatpush3.bf16.xpose.msra.mxu0 %v2024_v42 }
 0x199   : > { %1933 = vmatprep.subr.bf16.mxu1 %v3080_v45  ;;  %2029 = vmatprep.subr.bf16.mxu0 %v3022_v12 }
 0x19f   : > { %1711 = vmatmul.mubr.f32.vlgmr.msra.gmra.mrb[0].mxu1 %v3141_v9  ;;  %1825 = vmatmul.mubr.f32.vlgmr.msra.gmra.mrb[0].mxu0 %v3141_v9 }
 0x1a0   : > { %1935 = vmatpush3.bf16.xpose.msra.mxu1 %v3080_v45  ;;  %2031 = vmatpush3.bf16.xpose.msra.mxu0 %v3022_v12 }
 0x1a1   : > { %1937 = vmatprep.subr.bf16.mxu1 %v3090_v48  ;;  %2033 = vmatprep.subr.bf16.mxu0 %v3024_v13 }
 0x1a2   : > { %1713 = vmatprep.mubr.f32.mxu1 %v3153_v21  ;;  %1827 = vmatprep.mubr.f32.mxu0 %v3153_v21 }
 0x1a3   : > { %1714 = vmatmul.mubr.f32.gmra.mrb[2].mxu1 %v3158_v24  ;;  %1828 = vmatmul.mubr.f32.gmra.mrb[2].mxu0 %v3158_v24 }
 0x1a4   : > { %1748 = vmatprep.mubr.f32.mxu1 %v3038_v20  ;;  %1862 = vmatprep.mubr.f32.mxu0 %v3033_v17 }
 0x1a8   : > { %1939 = vmatpush3.bf16.xpose.msra.mxu1 %v3090_v48  ;;  %2035 = vmatpush3.bf16.xpose.msra.mxu0 %v3024_v13 }
 0x1a9   : > { %1941 = vmatprep.subr.bf16.mxu1 %v3096_v51  ;;  %2037 = vmatprep.subr.bf16.mxu0 %v3041_v22 }
 0x1b0   : > { %1943 = vmatpush3.bf16.xpose.msra.mxu1 %v3096_v51  ;;  %2039 = vmatpush3.bf16.xpose.msra.mxu0 %v3041_v22 }
 0x1b1   : > { %1945 = vmatprep.subr.bf16.mxu1 %v3100_v52  ;;  %2041 = vmatprep.subr.bf16.mxu0 %v3050_v29 }
 0x1b8   : > { %1947 = vmatpush3.bf16.xpose.msra.mxu1 %v3100_v52  ;;  %2043 = vmatpush3.bf16.xpose.msra.mxu0 %v3050_v29 }
 0x1b9   : > { %1949 = vmatprep.subr.bf16.mxu1 %v3104_v53  ;;  %2045 = vmatprep.subr.bf16.mxu0 %v3058_v34 }
 0x1c0   : > { %1951 = vmatpush3.bf16.xpose.msra.mxu1 %v3104_v53  ;;  %2047 = vmatpush3.bf16.xpose.msra.mxu0 %v3058_v34 }
 0x1c1   : > { %1953 = vmatprep.subr.bf16.mxu1 %v3118_v59  ;;  %2049 = vmatprep.subr.bf16.mxu0 %v3106_v54 }
 0x1c8   : > { %1955 = vmatpush3.bf16.xpose.msra.mxu1 %v3118_v59  ;;  %2051 = vmatpush3.bf16.xpose.msra.mxu0 %v3106_v54 }
 0x1c9   : > { %1957 = vmatprep.subr.bf16.mxu1 %v3135_v4  ;;  %2053 = vmatprep.subr.bf16.mxu0 %v3122_v62 }
 0x1d0   : > { %1959 = vmatpush3.bf16.xpose.msra.mxu1 %v3135_v4  ;;  %2055 = vmatpush3.bf16.xpose.msra.mxu0 %v3122_v62 }
 0x1d1   : > { %1961 = vmatprep.subr.bf16.mxu1 %v3164_v25  ;;  %2057 = vmatprep.subr.bf16.mxu0 %v3145_v14 }
 0x1d8   : > { %1963 = vmatpush3.bf16.xpose.msra.mxu1 %v3164_v25  ;;  %2059 = vmatpush3.bf16.xpose.msra.mxu0 %v3145_v14 }
 0x1df   : > { %1749 = vmatmul.mubr.f32.vlgmr.msra.gmra.mrb[0].mxu1 %v3156_v23  ;;  %1863 = vmatmul.mubr.f32.vlgmr.msra.gmra.mrb[0].mxu0 %v3141_v9 }
 0x1e0   : > { %1751 = vmatprep.mubr.f32.mxu1 %v3171_v31  ;;  %1865 = vmatprep.mubr.f32.mxu0 %v3153_v21 }
 0x1e3   : > { %1752 = vmatmul.mubr.f32.gmra.mrb[2].mxu1 %v3175_v33  ;;  %1866 = vmatmul.mubr.f32.gmra.mrb[2].mxu0 %v3158_v24 }
 0x2b2   : > { %v1750_v12 = vpop.f32.mrb[0].mxu1  ;;  %v1864_v13 = vpop.f32.mrb[0].mxu0  ;;  %1203 = sbr.rel (%p1502_p8) target bundleno = 699 (0x2bb), region = 86 }
 0x2b3   : > { %v2060_v17 = vadd.f32 %v1864_v13, %v1750_v12  ;;  %v820_v20 = vpop.f32.mrb[1].mxu1  ;;  %v1178_v22 = vpop.f32.mrb[1].mxu0 }
 0x2b4   : > { %v2061_v29 = vadd.f32 %v1178_v22, %v820_v20 }
 0x2b5   : > { %1205 = vst [vmem:[#allocation2 + $0x8] sm:$0xff] (!%p1502_p8), %v2060_v17 }
 0x2b6   : > { %v1753_v34 = vpop.f32.mrb[2].mxu1  ;;  %v1867_v45 = vpop.f32.mrb[2].mxu0  ;;  %1204 = vst [vmem:[#allocation2] sm:$0xff] (!%p1502_p8), %v2061_v29 }
 0x2b7   : > { %v2062_v48 = vadd.f32 %v1867_v45, %v1753_v34  ;;  %v834_v51 = vpop.f32.mrb[3].mxu1  ;;  %v1190_v52 = vpop.f32.mrb[3].mxu0 }
 0x2b8   : > { %v2063_v53 = vadd.f32 %v1190_v52, %v834_v51 }
 0x2b9   : > { %1207 = vst [vmem:[#allocation2 + $0x18] sm:$0xff] %v2062_v48 }
 0x2ba   : > { %1206 = vst [vmem:[#allocation2 + $0x10] sm:$0xff] %v2063_v53 }
 0x2bb PF: > { %s3539_s19 = sld [smem:[#allocation33_spill]] }
 0x2c1   : > { %p1503_p12 = scmp.le.s32.totalorder %s3539_s19, 0 }
 0x2c2   : > { %v1212_v54 = vld [vmem:[#allocation2] sm:$0xff] (!%p1503_p12)  ;;  %v1213_v59 = vld [vmem:[#allocation2 + $0x8] sm:$0xff] (!%p1503_p12)  ;;  %v1214_v62 = vld [vmem:[#allocation2 + $0x10] sm:$0xff] (!%p1503_p12) }
 0x2c3   : > { %1211 = sbr.rel (%p1503_p12) target bundleno = 714 (0x2ca), region = 90  ;;  %v1216_v4 = vadd.f32 (!%p1503_p12), %v2061_v29, %v1212_v54  ;;  %v1217_v9 = vadd.f32 (!%p1503_p12), %v2060_v17, %v1213_v59  ;;  %v1218_v14 = vadd.f32 (!%p1503_p12), %v2063_v53, %v1214_v62  ;;  %v1215_v18 = vld [vmem:[#allocation2 + $0x18] sm:$0xff] (!%p1503_p12) }
 0x2c4   : > { %v1219_v19 = vadd.f32 (!%p1503_p12), %v2062_v48, %v1215_v18 }
 0x2c5   : > { %1220 = vst [vmem:[#allocation2] sm:$0xff] (!%p1503_p12), %v1216_v4  ;;  %1221 = vst [vmem:[#allocation2 + $0x8] sm:$0xff] (!%p1503_p12), %v1217_v9 }
 0x2c6   : > { %1222 = vst [vmem:[#allocation2 + $0x10] sm:$0xff] (!%p1503_p12), %v1218_v14  ;;  %1223 = vst [vmem:[#allocation2 + $0x18] sm:$0xff] (!%p1503_p12), %v1219_v19 }
 0x2ca PF: > { %s3540_s21 = sld [smem:[#allocation33_spill]] }
 0x2d0   : > { %p1504_p11 = scmp.ne.s32.totalorder %s3540_s21, 1 }
 0x2d1   : > { %v3261_v21 = vld [vmem:[#allocation2] sm:$0xff] (!%p1504_p11)  ;;  %s3541_s20 = sld [smem:[#allocation34_spill]] (!%p1504_p11)  ;;  %v3263_v23 = vld [vmem:[#allocation2 + $0x8] sm:$0xff] (!%p1504_p11)  ;;  %v3265_v24 = vld [vmem:[#allocation2 + $0x10] sm:$0xff] (!%p1504_p11) }
 0x2d2   : > { %1227 = sbr.rel (%p1504_p11) target bundleno = 776 (0x308), region = 94  ;;  %v3270_v25 = vld [vmem:[#allocation2 + $0x18] sm:$0xff] (!%p1504_p11) }
 0x2d7   : > { %s3268_s18 = sld [smem:[#allocation8 + %s3541_s20]] (!%p1504_p11) }
 0x2dd   : > { %p1505_p13 = scmp.ne.s32.totalorder %s3268_s18, 0 }
 0x2de   : > { %1237 = vst [vmem:[%s3016_s30] sm:$0xff] (!%p1505_p13), %v3261_v21  ;;  %1238 = vst [vmem:[%s3016_s30 + $0x8] sm:$0xff] (!%p1505_p13), %v3263_v23 }
 0x2df   : > { %1236 = sbr.rel (%p1505_p13) target bundleno = 742 (0x2e6), region = 98  ;;  %1239 = vst [vmem:[%s3016_s30 + $0x10] sm:$0xff] (!%p1505_p13), %v3265_v24  ;;  %1240 = vst [vmem:[%s3016_s30 + $0x18] sm:$0xff] (!%p1505_p13), %v3270_v25 }
 0x2e6 PF: > { %p1506_p0 = scmp.eq.s32.totalorder %s3268_s18, 0 }
 0x2e7   : > { %s3542_s29 = sld [smem:[#allocation34_spill]] (!%p1506_p0)  ;;  %v1247_v31 = vlaneseq (!%p1506_p0)  ;;  %p1508_p1 = scmp.ne.s32.totalorder (!%p1506_p0), %s3268_s18, 1 }
 0x2e8   : > { %1244 = sbr.rel (%p1506_p0) target bundleno = 776 (0x308), region = 102 }
 0x2e9   : > { %v1248_v33 = vshrl.u32 (!%p1506_p0), %v1247_v31, 7 }
 0x2eb   : > { %v1249_v27 = vadd.s32 (!%p1506_p0), 8, %v1248_v33  ;;  %v1250_v28 = vadd.s32 (!%p1506_p0), 16, %v1248_v33  ;;  %v1251_v30 = vadd.s32 (!%p1506_p0), 24, %v1248_v33 }
 0x2ed   : > { %s1245_s6 = sld [smem:[#allocation4 + %s3542_s29]] (!%p1506_p0) }
 0x2ee   : > { %s1257_s15 = sld [smem:[#allocation6 + %s3542_s29]] (!%p1506_p0) }
 0x2ef   : > { %s1263_s0 = sld [smem:[#allocation7 + %s3542_s29]]  ;;  %v1277_v60 = vld [vmem:[%s3006_s23] sm:$0xff] (!%p1508_p1)  ;;  %v1278_v61 = vld [vmem:[%s3006_s23 + $0x8] sm:$0xff] (!%p1508_p1)  ;;  %v1279_v39 = vld [vmem:[%s3006_s23 + $0x10] sm:$0xff] (!%p1508_p1) }
 0x2f0   : > { %v1280_v63 = vld [vmem:[%s3006_s23 + $0x18] sm:$0xff] (!%p1508_p1) }
 0x2f3   : > { %s1507_s17 = sshll.u32 %s1245_s6, 5 }
 0x2f4   : > { %v1252_v32 = vstv %s1507_s17  ;;  %v1258_v35 = vstv %s1257_s15 }
 0x2f5   : > { %v1264_v36 = vstv %s1263_s0  ;;  %v1253_v37 = vadd.s32 %v1252_v32, %v1248_v33  ;;  %v1254_v38 = vadd.s32 %v1252_v32, %v1249_v27  ;;  %v1255_v49 = vadd.s32 %v1252_v32, %v1250_v28  ;;  %1276 = sbr.rel (%p1508_p1) target bundleno = 766 (0x2fe), region = 106 }
 0x2f6   : > { %v1256_v50 = vadd.s32 %v1252_v32, %v1251_v30 }
 0x2f7   : > { %vm1259_vm0 = vcmp.ge.s32.totalorder %v1253_v37, %v1258_v35  ;;  %vm1260_vm1 = vcmp.ge.s32.totalorder %v1254_v38, %v1258_v35  ;;  %vm1261_vm2 = vcmp.ge.s32.totalorder %v1255_v49, %v1258_v35  ;;  %vm1265_vm3 = vcmp.lt.s32.totalorder %v1253_v37, %v1264_v36 }
 0x2f8   : > { %vm1266_vm4 = vcmp.lt.s32.totalorder %v1254_v38, %v1264_v36  ;;  %vm1267_vm5 = vcmp.lt.s32.totalorder %v1255_v49, %v1264_v36  ;;  %vm1262_vm6 = vcmp.ge.s32.totalorder %v1256_v50, %v1258_v35  ;;  %vm1268_vm7 = vcmp.lt.s32.totalorder %v1256_v50, %v1264_v36  ;;  %vm3285_vm8 = vmand %vm1259_vm0, %vm1265_vm3 }
 0x2f9   : > { %vm3289_vm9 = vmand %vm1260_vm1, %vm1266_vm4  ;;  %v1289_v40 = vsel (!%p1508_p1), %vm3285_vm8, %v3261_v21, %v1277_v60 }
 0x2fa   : > { %vm3293_vm10 = vmand %vm1261_vm2, %vm1267_vm5  ;;  %v1290_v46 = vsel (!%p1508_p1), %vm3289_vm9, %v3263_v23, %v1278_v61  ;;  %1293 = vst [vmem:[%s3016_s30] sm:$0xff] (!%p1508_p1), %v1289_v40 }
 0x2fb   : > { %vm3297_vm11 = vmand %vm1262_vm6, %vm1268_vm7  ;;  %v1291_v47 = vsel (!%p1508_p1), %vm3293_vm10, %v3265_v24, %v1279_v39  ;;  %1294 = vst [vmem:[%s3016_s30 + $0x8] sm:$0xff] (!%p1508_p1), %v1290_v46 }
 0x2fc   : > { %1295 = vst [vmem:[%s3016_s30 + $0x10] sm:$0xff] %v1291_v47  ;;  %v1292_v0 = vsel %vm3297_vm11, %v3270_v25, %v1280_v63 }
 0x2fd   : > { %1296 = vst [vmem:[%s3016_s30 + $0x18] sm:$0xff] %v1292_v0 }
 0x2fe PF: > { %p1509_p4 = scmp.ne.s32.totalorder %s3268_s18, 2 }
 0x300   : > { %1300 = sbr.rel (%p1509_p4) target bundleno = 776 (0x308), region = 110 }
 0x303   : > { %v1301_v3 = vld [vmem:[%s3016_s30] sm:$0xff] (!%p1509_p4) }
 0x304   : > { %v1302_v5 = vld [vmem:[%s3016_s30 + $0x8] sm:$0xff] (!%p1509_p4)  ;;  %v1313_v7 = vsel (!%p1509_p4), %vm3285_vm8, %v3261_v21, %v1301_v3  ;;  %v1304_v8 = vld [vmem:[%s3016_s30 + $0x18] sm:$0xff] (!%p1509_p4) }
 0x305   : > { %v1303_v6 = vld [vmem:[%s3016_s30 + $0x10] sm:$0xff] (!%p1509_p4)  ;;  %v1314_v57 = vsel (!%p1509_p4), %vm3289_vm9, %v3263_v23, %v1302_v5  ;;  %1317 = vst [vmem:[%s3016_s30] sm:$0xff] (!%p1509_p4), %v1313_v7  ;;  %v1316_v10 = vsel (!%p1509_p4), %vm3297_vm11, %v3270_v25, %v1304_v8 }
 0x306   : > { %v1315_v58 = vsel (!%p1509_p4), %vm3293_vm10, %v3265_v24, %v1303_v6  ;;  %1318 = vst [vmem:[%s3016_s30 + $0x8] sm:$0xff] (!%p1509_p4), %v1314_v57  ;;  %1320 = vst [vmem:[%s3016_s30 + $0x18] sm:$0xff] (!%p1509_p4), %v1316_v10 }
 0x307   : > { %1319 = vst [vmem:[%s3016_s30 + $0x10] sm:$0xff] %v1315_v58 }
 0x308 PF: > { %s3551_s22 = sld [smem:[#allocation45_spill]]  ;;  %s3553_s27 = sld [smem:[#allocation34_spill]] }
 0x309   : > { %s3554_s9 = sld [smem:[#allocation35_spill]]  ;;  %s1338_s3 = sshll.u32 %s3016_s30, 4  ;;  %s3349_s3 = int_to_ptr.vmem [resolvable:$true] %s1338_s3 }
 0x30a   : > { %s3556_s4 = sld [smem:[#allocation52_spill]]  ;;  %s3359_s21 = scalar_lea.sflag [#allocation14], %s390_s13 }
 0x30b   : > { %s2396_s20 = scalar_lea.vmem %s3349_s3, 512  ;;  %s2594_s30 = smov [#allocation17]  }
 0x30c   : > { %p2397_p9 = scmp.ne.s32.totalorder %s3349_s3, %s2396_s20  ;;  %s2400_s18 = sshll.u32 %s2594_s30, 4  ;;  %s2401_s18 = int_to_ptr.vmem [resolvable:$false] %s2400_s18 }
 0x30d   : > { %s2402_s29 = scalar_lea.vmem %s2401_s18, 1024  ;;  %p2403_p7 = scmp.lt.s32.totalorder %s3349_s3, %s2401_s18 }
 0x30e   : > { %p3552_p2 = scmp.ne.s32.totalorder %s3551_s22, 0  ;;  %p2404_p5 = scmp.lt.s32.totalorder %s2402_s29, %s2396_s20 }
 0x310   : > { %s2090_s16 = scalar_select %p3552_p2, [#allocation4], [#allocation21] }
 0x311   : > { %s3594_s27 = smov (!%p3552_p2, %s3553_s27), 0  ;;  %p2398_p6 = pnand %p2397_p9, %p3552_p2 }
 0x312   : > { %s1329_s1 = sld [smem:[%s2090_s16 + %s3594_s27]]  ;;  %p2405_p3 = por %p2404_p5, %p2403_p7 }
 0x313   : > { %p2399_p10 = pneg %p2398_p6 }
 0x315   : > { %p2406_p8 = pnand %p2405_p3, %p2399_p10 }
 0x318   : > { %s1519_s23 = sshll.u32 %s1329_s1, 3 }
 0x319   : > { %s1335_s25 = sadd.s32 %s3554_s9, %s1519_s23 }
 0x31a   : > { %s1513_s2 = sshll.u32 %s1335_s25, 7 }
 0x31b   : > { %s3355_s19 = scalar_lea.hbm %s3556_s4, %s1513_s2 }
 0x31c   : > { %2409 = shalt.err (!%p2406_p8)
}
 0x31d   : > { %s2410_s13 = scalar_lea.hbm %s3355_s19, 512  ;;  %s2414_s0 = scalar_lea.hbm %s3556_s4, 4096 }
 0x31e   : > { %p2411_p12 = scmp.ne.s32.totalorder %s3355_s19, %s2410_s13  ;;  %p2415_p0 = scmp.lt.u32.totalorder %s3355_s19, %s3556_s4 }
 0x31f   : > { %p2416_p1 = scmp.lt.u32.totalorder %s2414_s0, %s2410_s13  ;;  %p2418_p9 = scmp.lt.u32.totalorder %s2410_s13, %s3355_s19 }
 0x320   : > { %p2412_p11 = pnand %p2411_p12, %p3552_p2 }
 0x321   : > { %p2417_p4 = por %p2416_p1, %p2415_p0 }
 0x322   : > { %p2413_p13 = pneg %p2412_p11 }
 0x323   : > { %p2419_p6 = por %p2418_p9, %p2417_p4 }
 0x325   : > { %p2420_p10 = pnand %p2419_p6, %p2413_p13 }
 0x327   : > { %2423 = shalt.err (!%p2420_p10)
}
 0x328   : > { %s2595_s9 = smov 128   ;;  %s2596_s7 = smov 256  }
 0x329   : > { %s2597_s16 = smov 8  }
 0x32a   : > { %2092 = dma.vmem_to_hbm [thread:$0]  (%p3552_p2), %s3349_s3, 512, %s3355_s19, %s3359_s21, %s2595_s9, %s2596_s7, %s2597_s16  }
 0x32b PF: > { %s3557_s1 = sld [smem:[#allocation26_spill]]  ;;  %s3558_s23 = sld [smem:[#allocation47_spill]] }
 0x32c   : > { %p2098_p7 = scmp.ge.s32.totalorder %s2580_s14, 2 }
 0x331   : > { %s1353_s25 = sand.u32 1, %s3557_s1   ;;  %p3559_p5 = scmp.ne.s32.totalorder %s3558_s23, 0 }
 0x332   : > { %s1354_s2 = scalar_lea.sflag [#allocation14], %s1353_s25 }
 0x333   : > { %p2095_p3 = pnand %p2098_p7, %p3559_p5 }
 0x335   : > { %2507 = dma.done.wait (!%p2095_p3), %s1354_s2, 512  }
 0x336   : > { %2509 = vsyncadd (!%p2095_p3), %s1354_s2, 4294966784  ;;  %s59_s14 = sadd.s32 1, %s2580_s14   ;;  %s3561_s6 = sld [smem:[#allocation27_spill]] }
 0x337   : > { %p3388_p8 = scmp.ge.s32.totalorder %s59_s14, 34   ;;  %s3562_s0 = sld [smem:[#allocation28_spill]] }
 0x338   : > { %s3563_s1 = sld [smem:[#allocation48_spill]]  ;;  %s3564_s22 = sld [smem:[#allocation29_spill]] }
 0x339   : > { %s3565_s3 = sld [smem:[#allocation46_spill]]  ;;  %s3567_s27 = sld [smem:[#allocation43_spill]] }
 0x33a   : > { %s3566_s28 = sld [smem:[#allocation30_spill]]  ;;  %s3568_s19 = sld [smem:[#allocation32_spill]] }
 0x33b   : > { %s3569_s29 = sld [smem:[#allocation42_spill]]  ;;  %s3570_s30 = sld [smem:[#allocation36_spill]] }
 0x33c   : > { %s3571_s21 = sld [smem:[#allocation37_spill]]  ;;  %s3572_s20 = sld [smem:[#allocation38_spill]] }
 0x33d   : > { %s3573_s13 = sld [smem:[#allocation40_spill]]  ;;  %s3574_s23 = smov %s2532_s24 }
 0x33e   : > { %s3576_s25 = smov %s2540_s26  ;;  %s3579_s2 = smov %s2568_s11 }
 0x33f   : > { %s3575_s24 = smov %s3565_s3  ;;  %s3580_s3 = smov %s2572_s12 }
 0x340   : > { %s3577_s26 = smov %s3566_s28  ;;  %s3578_s28 = smov %s3568_s19 }
 0x341   :  { %58 = sbr.rel (!%p3388_p8) target bundleno = 93 (0x5d), region = 168 }
 0x342   : > { %s3581_s11 = smov %s3571_s21  ;;  %s3582_s12 = smov %s3572_s20 }
 0x348   :  { %1359 = vsyncpa [#allocation13], 1 }
 0x349   :  { %1361 = vsyncpa [#allocation13 + $0x1], 1 }
 0x34a   :  { %1362 = vsyncpa [#allocation16], 1 }
 0x34b   :  { %1364 = vsyncpa [#allocation16 + $0x1], 1 }
 0x34c   :  { %1365 = vsyncpa [#allocation14], 1 }
 0x34d   :  { %1367 = vsyncpa [#allocation14 + $0x1], 1 }

</bundles_post_ra>
